<compile_context>
chip_gen: v7x
topology: tpu7x:2x2x1
jax: 0.10.0
libtpu: 0.0.40
codegen_flags: <defaults>
</compile_context>

<pallas_src>
import functools
import math
import types

import jax
import jax.numpy as jnp
import numpy as np
from jax.experimental import pallas as pl
from jax.experimental.pallas import tpu as pltpu


# ----------------------------- fused Pallas kernel ---------------------------

def fused_rnn_kernel(*refs, groups, add_nl_layer, T, B, H):
    """Entire _RNN forward.

    refs = (x_ref, [wih, whh, b] * n_cells, [mlp_w, mlp_b]?, ada_w, ada_b, o_ref)

    x_ref:  (T*B, Din0)        VMEM
    wih:    (Din, 4H)          fused gates, order (i, f, o, g)
    whh:    (H, 4H)
    b:      (1, 4H)            (= b_ih + b_hh)
    ada_w:  (H, Dpad)          lane-padded adapter weight (Dpad multiple of 128)
    o_ref:  (T*B, Dpad)        output (sliced to output_size outside)
    """
    refs = list(refs)
    o_ref = refs.pop()                       # outputs come after inputs
    x_ref = refs.pop(0)

    n_cells = sum(len(g) for g in groups)
    cell_refs = [tuple(refs[3 * i:3 * i + 3]) for i in range(n_cells)]
    idx = 3 * n_cells
    if add_nl_layer:
        mlp_w_ref, mlp_b_ref = refs[idx], refs[idx + 1]
        idx += 2
    ada_w_ref, ada_b_ref = refs[idx], refs[idx + 1]

    data = x_ref[...]                        # (T*B, Din0) current sequence

    ci = 0
    for g_idx, dil_group in enumerate(groups):
        residual = data
        h_seq = data
        for d in dil_group:
            wih_ref, whh_ref, b_ref = cell_refs[ci]
            ci += 1
            whh = whh_ref[...]                                    # (H, 4H)

            # Hoisted input projection: single fused matmul + bias, off the
            # serial critical path.
            pre = (jnp.dot(h_seq, wih_ref[...],
                           preferred_element_type=jnp.float32)
                   + b_ref[...])                                  # (T*B, 4H)

            h_list, c_list = [], []
            for t in range(T):               # fully unrolled (static, small T)
                gates = pre[t * B:(t + 1) * B]                    # (B, 4H)
                if t >= d:
                    gates = gates + jnp.dot(h_list[t - d], whh,
                                            preferred_element_type=jnp.float32)

                # gate layout (i, f, o, g): one sigmoid over 3H, one tanh over H
                sig = jax.nn.sigmoid(gates[:, :3 * H])
                g_g = jnp.tanh(gates[:, 3 * H:])
                i_g = sig[:, :H]
                f_g = sig[:, H:2 * H]
                o_g = sig[:, 2 * H:3 * H]

                if t >= d:
                    c_t = f_g * c_list[t - d] + i_g * g_g
                else:                        # prologue: zero initial state
                    c_t = i_g * g_g
                h_t = o_g * jnp.tanh(c_t)

                h_list.append(h_t)
                c_list.append(c_t)

            h_seq = jnp.concatenate(h_list, axis=0)               # (T*B, H)

        if g_idx > 0:                        # residual add (torch: layer_num > 0)
            h_seq = h_seq + residual
        data = h_seq

    if add_nl_layer:
        data = jnp.tanh(jnp.dot(data, mlp_w_ref[...],
                                preferred_element_type=jnp.float32)
                        + mlp_b_ref[...])

    out = (jnp.dot(data, ada_w_ref[...], preferred_element_type=jnp.float32)
           + ada_b_ref[...])                                      # (T*B, Dpad)
    o_ref[...] = out                         # lane-dense, unmasked store


# --------------------------------- wrapper -----------------------------------

def rnn_forward(params, x, mc):
    T, B, Din0 = x.shape
    H = mc.state_hsize
    out_size = mc.output_size
    out_pad = pl.cdiv(out_size, 128) * 128   # lane-dense output slab
    groups = tuple(tuple(g) for g in mc.dilations)

    x2 = x.reshape(T * B, Din0)
    ada_w = jnp.pad(params["ada_w"], ((0, 0), (0, out_pad - out_size)))
    ada_b = jnp.pad(params["ada_b"], ((0, 0), (0, out_pad - out_size)))

    inputs = [x2]
    for cells in params["drnn"]:
        for cell in cells:
            inputs += [cell["wih"], cell["whh"], cell["b"]]
    if mc.add_nl_layer:
        inputs += [params["mlp_w"], params["mlp_b"]]
    inputs += [ada_w, ada_b]

    vmem = pl.BlockSpec(memory_space=pltpu.MemorySpace.VMEM)
    kernel = functools.partial(fused_rnn_kernel, groups=groups,
                               add_nl_layer=mc.add_nl_layer, T=T, B=B, H=H)
    out2 = pl.pallas_call(
        kernel,
        out_shape=jax.ShapeDtypeStruct((T * B, out_pad), jnp.float32),
        in_specs=[vmem] * len(inputs),
        out_specs=vmem,
    )(*inputs)
    return out2.reshape(T, B, out_pad)[:, :, :out_size]


# ------------------------------ params init ----------------------------------

def init_params(key, mc):
    """Fused-gate weights: W_ih (Din, 4H), W_hh (H, 4H), b (1, 4H), order (i,f,o,g)."""
    H = mc.state_hsize
    bound = 1.0 / math.sqrt(H)
    params = {"drnn": []}
    for g, dil_group in enumerate(mc.dilations):
        cells = []
        for j, _d in enumerate(dil_group):
            din = (mc.input_size + mc.exogenous_size) if (g == 0 and j == 0) else H
            key, k1, k2, k3, k4 = jax.random.split(key, 5)
            wih = jax.random.uniform(k1, (din, 4 * H), jnp.float32, -bound, bound)
            whh = jax.random.uniform(k2, (H, 4 * H), jnp.float32, -bound, bound)
            b_ih = jax.random.uniform(k3, (1, 4 * H), jnp.float32, -bound, bound)
            b_hh = jax.random.uniform(k4, (1, 4 * H), jnp.float32, -bound, bound)
            cells.append({"wih": wih, "whh": whh, "b": b_ih + b_hh})
        params["drnn"].append(cells)

    if mc.add_nl_layer:
        key, k1, k2 = jax.random.split(key, 3)
        params["mlp_w"] = jax.random.uniform(k1, (H, H), jnp.float32, -bound, bound)
        params["mlp_b"] = jax.random.uniform(k2, (1, H), jnp.float32, -bound, bound)

    key, k1, k2 = jax.random.split(key, 3)
    params["ada_w"] = jax.random.uniform(k1, (H, mc.output_size), jnp.float32,
                                         -bound, bound)
    params["ada_b"] = jax.random.uniform(k2, (1, mc.output_size), jnp.float32,
                                         -bound, bound)
    return params


# --------------------------- pure-JAX reference -------------------------------

def _ref_dilated_lstm(x_seq, wih, whh, b, d):
    T, B, _ = x_seq.shape
    H = whh.shape[0]
    hs, cs = [], []
    for t in range(T):
        gates = x_seq[t] @ wih + b
        if t >= d:
            gates = gates + hs[t - d] @ whh
            c_prev = cs[t - d]
        else:
            c_prev = jnp.zeros((B, H), jnp.float32)
        i = jax.nn.sigmoid(gates[:, :H])
        f = jax.nn.sigmoid(gates[:, H:2 * H])
        o = jax.nn.sigmoid(gates[:, 2 * H:3 * H])
        g = jnp.tanh(gates[:, 3 * H:])
        c = f * c_prev + i * g
        h = o * jnp.tanh(c)
        hs.append(h)
        cs.append(c)
    return jnp.stack(hs)


def rnn_forward_ref(params, x, mc):
    data = x
    for g, dil_group in enumerate(mc.dilations):
        residual = data
        h = data
        for j, d in enumerate(dil_group):
            cell = params["drnn"][g][j]
            h = _ref_dilated_lstm(h, cell["wih"], cell["whh"], cell["b"], d)
        if g > 0:
            h = h + residual
        data = h
    if mc.add_nl_layer:
        data = jnp.tanh(data @ params["mlp_w"] + params["mlp_b"])
    data = data @ params["ada_w"] + params["ada_b"]
    return data


# ----------------------------------- main -------------------------------------

if __name__ == "__main__":
    mc = types.SimpleNamespace(
        input_size=4,
        exogenous_size=2,
        state_hsize=32,
        output_size=6,
        dilations=[[1, 2], [2, 4]],   # two DRNN groups, two dilated cells each
        add_nl_layer=True,
    )
    T, B = 8, 2

    key = jax.random.PRNGKey(0)
    key, kx = jax.random.split(key)
    x = jax.random.normal(kx, (T, B, mc.input_size + mc.exogenous_size),
                          dtype=jnp.float32)
    params = init_params(key, mc)

    fwd = jax.jit(lambda p, xx: rnn_forward(p, xx, mc))
    out = jax.block_until_ready(fwd(params, x))

    assert out.shape == (T, B, mc.output_size), out.shape

    ref = rnn_forward_ref(params, x, mc)
    np.testing.assert_allclose(np.asarray(out), np.asarray(ref),
                               atol=1e-3, rtol=1e-3)

    print("KERNEL_OK")
</pallas_src>

<mosaic_0001>
module attributes {stable_mosaic.version = 11 : i64} {
  func.func @fused_rnn_kernel(%arg0: memref<16x6xf32, #tpu.memory_space<vmem>>, %arg1: memref<6x128xf32, #tpu.memory_space<vmem>>, %arg2: memref<32x128xf32, #tpu.memory_space<vmem>>, %arg3: memref<1x128xf32, #tpu.memory_space<vmem>>, %arg4: memref<32x128xf32, #tpu.memory_space<vmem>>, %arg5: memref<32x128xf32, #tpu.memory_space<vmem>>, %arg6: memref<1x128xf32, #tpu.memory_space<vmem>>, %arg7: memref<32x128xf32, #tpu.memory_space<vmem>>, %arg8: memref<32x128xf32, #tpu.memory_space<vmem>>, %arg9: memref<1x128xf32, #tpu.memory_space<vmem>>, %arg10: memref<32x128xf32, #tpu.memory_space<vmem>>, %arg11: memref<32x128xf32, #tpu.memory_space<vmem>>, %arg12: memref<1x128xf32, #tpu.memory_space<vmem>>, %arg13: memref<32x32xf32, #tpu.memory_space<vmem>>, %arg14: memref<1x32xf32, #tpu.memory_space<vmem>>, %arg15: memref<32x128xf32, #tpu.memory_space<vmem>>, %arg16: memref<1x128xf32, #tpu.memory_space<vmem>>, %arg17: memref<16x128xf32, #tpu.memory_space<vmem>>) attributes {dimension_semantics = [], scalar_prefetch = 0 : i64, scratch_operands = 0 : i64, tpu.core_type = #tpu.core_type<tc>} {
    %c0 = arith.constant 0 : index
    %c0_0 = arith.constant 0 : index
    %0 = vector.load %arg0[%c0, %c0_0] : memref<16x6xf32, #tpu.memory_space<vmem>>, vector<16x6xf32>
    %c0_1 = arith.constant 0 : index
    %c0_2 = arith.constant 0 : index
    %1 = vector.load %arg2[%c0_1, %c0_2] : memref<32x128xf32, #tpu.memory_space<vmem>>, vector<32x128xf32>
    %c0_3 = arith.constant 0 : index
    %c0_4 = arith.constant 0 : index
    %2 = vector.load %arg1[%c0_3, %c0_4] : memref<6x128xf32, #tpu.memory_space<vmem>>, vector<6x128xf32>
    %cst = arith.constant dense<0.000000e+00> : vector<16x128xf32>
    %3 = tpu.matmul %0, %2, %cst {dimension_numbers = #tpu.dot_dimension_numbers<[1], [0], [0], [1], [0, 0, 1, 1], [], []>} : vector<16x6xf32>, vector<6x128xf32>, vector<16x128xf32> -> vector<16x128xf32>
    %c0_5 = arith.constant 0 : index
    %c0_6 = arith.constant 0 : index
    %4 = vector.load %arg3[%c0_5, %c0_6] : memref<1x128xf32, #tpu.memory_space<vmem>>, vector<1x128xf32>
    %5 = vector.broadcast %4 : vector<1x128xf32> to vector<16x128xf32>
    %6 = arith.addf %3, %5 : vector<16x128xf32>
    %7 = vector.extract_strided_slice %6 {offsets = [0, 0], sizes = [2, 128], strides = [1, 1]} : vector<16x128xf32> to vector<2x128xf32>
    %8 = vector.extract_strided_slice %7 {offsets = [0, 0], sizes = [2, 96], strides = [1, 1]} : vector<2x128xf32> to vector<2x96xf32>
    %9 = arith.negf %8 : vector<2x96xf32>
    %10 = math.exp %9 : vector<2x96xf32>
    %cst_7 = arith.constant 1.000000e+00 : f32
    %11 = vector.broadcast %cst_7 : f32 to vector<2x96xf32>
    %12 = arith.addf %11, %10 : vector<2x96xf32>
    %13 = arith.divf %11, %12 : vector<2x96xf32>
    %14 = vector.extract_strided_slice %7 {offsets = [0, 96], sizes = [2, 32], strides = [1, 1]} : vector<2x128xf32> to vector<2x32xf32>
    %15 = math.tanh %14 : vector<2x32xf32>
    %16 = vector.extract_strided_slice %13 {offsets = [0, 0], sizes = [2, 32], strides = [1, 1]} : vector<2x96xf32> to vector<2x32xf32>
    %17 = vector.extract_strided_slice %13 {offsets = [0, 64], sizes = [2, 32], strides = [1, 1]} : vector<2x96xf32> to vector<2x32xf32>
    %18 = arith.mulf %16, %15 : vector<2x32xf32>
    %19 = math.tanh %18 : vector<2x32xf32>
    %20 = arith.mulf %17, %19 : vector<2x32xf32>
    %21 = vector.extract_strided_slice %6 {offsets = [2, 0], sizes = [2, 128], strides = [1, 1]} : vector<16x128xf32> to vector<2x128xf32>
    %cst_8 = arith.constant dense<0.000000e+00> : vector<2x128xf32>
    %22 = tpu.matmul %20, %1, %cst_8 {dimension_numbers = #tpu.dot_dimension_numbers<[1], [0], [0], [1], [0, 0, 1, 1], [], []>} : vector<2x32xf32>, vector<32x128xf32>, vector<2x128xf32> -> vector<2x128xf32>
    %23 = arith.addf %21, %22 : vector<2x128xf32>
    %24 = vector.extract_strided_slice %23 {offsets = [0, 0], sizes = [2, 96], strides = [1, 1]} : vector<2x128xf32> to vector<2x96xf32>
    %25 = arith.negf %24 : vector<2x96xf32>
    %26 = math.exp %25 : vector<2x96xf32>
    %cst_9 = arith.constant 1.000000e+00 : f32
    %27 = vector.broadcast %cst_9 : f32 to vector<2x96xf32>
    %28 = arith.addf %27, %26 : vector<2x96xf32>
    %29 = arith.divf %27, %28 : vector<2x96xf32>
    %30 = vector.extract_strided_slice %23 {offsets = [0, 96], sizes = [2, 32], strides = [1, 1]} : vector<2x128xf32> to vector<2x32xf32>
    %31 = math.tanh %30 : vector<2x32xf32>
    %32 = vector.extract_strided_slice %29 {offsets = [0, 0], sizes = [2, 32], strides = [1, 1]} : vector<2x96xf32> to vector<2x32xf32>
    %33 = vector.extract_strided_slice %29 {offsets = [0, 32], sizes = [2, 32], strides = [1, 1]} : vector<2x96xf32> to vector<2x32xf32>
    %34 = vector.extract_strided_slice %29 {offsets = [0, 64], sizes = [2, 32], strides = [1, 1]} : vector<2x96xf32> to vector<2x32xf32>
    %35 = arith.mulf %33, %18 : vector<2x32xf32>
    %36 = arith.mulf %32, %31 : vector<2x32xf32>
    %37 = arith.addf %35, %36 : vector<2x32xf32>
    %38 = math.tanh %37 : vector<2x32xf32>
    %39 = arith.mulf %34, %38 : vector<2x32xf32>
    %40 = vector.extract_strided_slice %6 {offsets = [4, 0], sizes = [2, 128], strides = [1, 1]} : vector<16x128xf32> to vector<2x128xf32>
    %cst_10 = arith.constant dense<0.000000e+00> : vector<2x128xf32>
    %41 = tpu.matmul %39, %1, %cst_10 {dimension_numbers = #tpu.dot_dimension_numbers<[1], [0], [0], [1], [0, 0, 1, 1], [], []>} : vector<2x32xf32>, vector<32x128xf32>, vector<2x128xf32> -> vector<2x128xf32>
    %42 = arith.addf %40, %41 : vector<2x128xf32>
    %43 = vector.extract_strided_slice %42 {offsets = [0, 0], sizes = [2, 96], strides = [1, 1]} : vector<2x128xf32> to vector<2x96xf32>
    %44 = arith.negf %43 : vector<2x96xf32>
    %45 = math.exp %44 : vector<2x96xf32>
    %cst_11 = arith.constant 1.000000e+00 : f32
    %46 = vector.broadcast %cst_11 : f32 to vector<2x96xf32>
    %47 = arith.addf %46, %45 : vector<2x96xf32>
    %48 = arith.divf %46, %47 : vector<2x96xf32>
    %49 = vector.extract_strided_slice %42 {offsets = [0, 96], sizes = [2, 32], strides = [1, 1]} : vector<2x128xf32> to vector<2x32xf32>
    %50 = math.tanh %49 : vector<2x32xf32>
    %51 = vector.extract_strided_slice %48 {offsets = [0, 0], sizes = [2, 32], strides = [1, 1]} : vector<2x96xf32> to vector<2x32xf32>
    %52 = vector.extract_strided_slice %48 {offsets = [0, 32], sizes = [2, 32], strides = [1, 1]} : vector<2x96xf32> to vector<2x32xf32>
    %53 = vector.extract_strided_slice %48 {offsets = [0, 64], sizes = [2, 32], strides = [1, 1]} : vector<2x96xf32> to vector<2x32xf32>
    %54 = arith.mulf %52, %37 : vector<2x32xf32>
    %55 = arith.mulf %51, %50 : vector<2x32xf32>
    %56 = arith.addf %54, %55 : vector<2x32xf32>
    %57 = math.tanh %56 : vector<2x32xf32>
    %58 = arith.mulf %53, %57 : vector<2x32xf32>
    %59 = vector.extract_strided_slice %6 {offsets = [6, 0], sizes = [2, 128], strides = [1, 1]} : vector<16x128xf32> to vector<2x128xf32>
    %cst_12 = arith.constant dense<0.000000e+00> : vector<2x128xf32>
    %60 = tpu.matmul %58, %1, %cst_12 {dimension_numbers = #tpu.dot_dimension_numbers<[1], [0], [0], [1], [0, 0, 1, 1], [], []>} : vector<2x32xf32>, vector<32x128xf32>, vector<2x128xf32> -> vector<2x128xf32>
    %61 = arith.addf %59, %60 : vector<2x128xf32>
    %62 = vector.extract_strided_slice %61 {offsets = [0, 0], sizes = [2, 96], strides = [1, 1]} : vector<2x128xf32> to vector<2x96xf32>
    %63 = arith.negf %62 : vector<2x96xf32>
    %64 = math.exp %63 : vector<2x96xf32>
    %cst_13 = arith.constant 1.000000e+00 : f32
    %65 = vector.broadcast %cst_13 : f32 to vector<2x96xf32>
    %66 = arith.addf %65, %64 : vector<2x96xf32>
    %67 = arith.divf %65, %66 : vector<2x96xf32>
    %68 = vector.extract_strided_slice %61 {offsets = [0, 96], sizes = [2, 32], strides = [1, 1]} : vector<2x128xf32> to vector<2x32xf32>
    %69 = math.tanh %68 : vector<2x32xf32>
    %70 = vector.extract_strided_slice %67 {offsets = [0, 0], sizes = [2, 32], strides = [1, 1]} : vector<2x96xf32> to vector<2x32xf32>
    %71 = vector.extract_strided_slice %67 {offsets = [0, 32], sizes = [2, 32], strides = [1, 1]} : vector<2x96xf32> to vector<2x32xf32>
    %72 = vector.extract_strided_slice %67 {offsets = [0, 64], sizes = [2, 32], strides = [1, 1]} : vector<2x96xf32> to vector<2x32xf32>
    %73 = arith.mulf %71, %56 : vector<2x32xf32>
    %74 = arith.mulf %70, %69 : vector<2x32xf32>
    %75 = arith.addf %73, %74 : vector<2x32xf32>
    %76 = math.tanh %75 : vector<2x32xf32>
    %77 = arith.mulf %72, %76 : vector<2x32xf32>
    %78 = vector.extract_strided_slice %6 {offsets = [8, 0], sizes = [2, 128], strides = [1, 1]} : vector<16x128xf32> to vector<2x128xf32>
    %cst_14 = arith.constant dense<0.000000e+00> : vector<2x128xf32>
    %79 = tpu.matmul %77, %1, %cst_14 {dimension_numbers = #tpu.dot_dimension_numbers<[1], [0], [0], [1], [0, 0, 1, 1], [], []>} : vector<2x32xf32>, vector<32x128xf32>, vector<2x128xf32> -> vector<2x128xf32>
    %80 = arith.addf %78, %79 : vector<2x128xf32>
    %81 = vector.extract_strided_slice %80 {offsets = [0, 0], sizes = [2, 96], strides = [1, 1]} : vector<2x128xf32> to vector<2x96xf32>
    %82 = arith.negf %81 : vector<2x96xf32>
    %83 = math.exp %82 : vector<2x96xf32>
    %cst_15 = arith.constant 1.000000e+00 : f32
    %84 = vector.broadcast %cst_15 : f32 to vector<2x96xf32>
    %85 = arith.addf %84, %83 : vector<2x96xf32>
    %86 = arith.divf %84, %85 : vector<2x96xf32>
    %87 = vector.extract_strided_slice %80 {offsets = [0, 96], sizes = [2, 32], strides = [1, 1]} : vector<2x128xf32> to vector<2x32xf32>
    %88 = math.tanh %87 : vector<2x32xf32>
    %89 = vector.extract_strided_slice %86 {offsets = [0, 0], sizes = [2, 32], strides = [1, 1]} : vector<2x96xf32> to vector<2x32xf32>
    %90 = vector.extract_strided_slice %86 {offsets = [0, 32], sizes = [2, 32], strides = [1, 1]} : vector<2x96xf32> to vector<2x32xf32>
    %91 = vector.extract_strided_slice %86 {offsets = [0, 64], sizes = [2, 32], strides = [1, 1]} : vector<2x96xf32> to vector<2x32xf32>
    %92 = arith.mulf %90, %75 : vector<2x32xf32>
    %93 = arith.mulf %89, %88 : vector<2x32xf32>
    %94 = arith.addf %92, %93 : vector<2x32xf32>
    %95 = math.tanh %94 : vector<2x32xf32>
    %96 = arith.mulf %91, %95 : vector<2x32xf32>
    %97 = vector.extract_strided_slice %6 {offsets = [10, 0], sizes = [2, 128], strides = [1, 1]} : vector<16x128xf32> to vector<2x128xf32>
    %cst_16 = arith.constant dense<0.000000e+00> : vector<2x128xf32>
    %98 = tpu.matmul %96, %1, %cst_16 {dimension_numbers = #tpu.dot_dimension_numbers<[1], [0], [0], [1], [0, 0, 1, 1], [], []>} : vector<2x32xf32>, vector<32x128xf32>, vector<2x128xf32> -> vector<2x128xf32>
    %99 = arith.addf %97, %98 : vector<2x128xf32>
    %100 = vector.extract_strided_slice %99 {offsets = [0, 0], sizes = [2, 96], strides = [1, 1]} : vector<2x128xf32> to vector<2x96xf32>
    %101 = arith.negf %100 : vector<2x96xf32>
    %102 = math.exp %101 : vector<2x96xf32>
    %cst_17 = arith.constant 1.000000e+00 : f32
    %103 = vector.broadcast %cst_17 : f32 to vector<2x96xf32>
    %104 = arith.addf %103, %102 : vector<2x96xf32>
    %105 = arith.divf %103, %104 : vector<2x96xf32>
    %106 = vector.extract_strided_slice %99 {offsets = [0, 96], sizes = [2, 32], strides = [1, 1]} : vector<2x128xf32> to vector<2x32xf32>
    %107 = math.tanh %106 : vector<2x32xf32>
    %108 = vector.extract_strided_slice %105 {offsets = [0, 0], sizes = [2, 32], strides = [1, 1]} : vector<2x96xf32> to vector<2x32xf32>
    %109 = vector.extract_strided_slice %105 {offsets = [0, 32], sizes = [2, 32], strides = [1, 1]} : vector<2x96xf32> to vector<2x32xf32>
    %110 = vector.extract_strided_slice %105 {offsets = [0, 64], sizes = [2, 32], strides = [1, 1]} : vector<2x96xf32> to vector<2x32xf32>
    %111 = arith.mulf %109, %94 : vector<2x32xf32>
    %112 = arith.mulf %108, %107 : vector<2x32xf32>
    %113 = arith.addf %111, %112 : vector<2x32xf32>
    %114 = math.tanh %113 : vector<2x32xf32>
    %115 = arith.mulf %110, %114 : vector<2x32xf32>
    %116 = vector.extract_strided_slice %6 {offsets = [12, 0], sizes = [2, 128], strides = [1, 1]} : vector<16x128xf32> to vector<2x128xf32>
    %cst_18 = arith.constant dense<0.000000e+00> : vector<2x128xf32>
    %117 = tpu.matmul %115, %1, %cst_18 {dimension_numbers = #tpu.dot_dimension_numbers<[1], [0], [0], [1], [0, 0, 1, 1], [], []>} : vector<2x32xf32>, vector<32x128xf32>, vector<2x128xf32> -> vector<2x128xf32>
    %118 = arith.addf %116, %117 : vector<2x128xf32>
    %119 = vector.extract_strided_slice %118 {offsets = [0, 0], sizes = [2, 96], strides = [1, 1]} : vector<2x128xf32> to vector<2x96xf32>
    %120 = arith.negf %119 : vector<2x96xf32>
    %121 = math.exp %120 : vector<2x96xf32>
    %cst_19 = arith.constant 1.000000e+00 : f32
    %122 = vector.broadcast %cst_19 : f32 to vector<2x96xf32>
    %123 = arith.addf %122, %121 : vector<2x96xf32>
    %124 = arith.divf %122, %123 : vector<2x96xf32>
    %125 = vector.extract_strided_slice %118 {offsets = [0, 96], sizes = [2, 32], strides = [1, 1]} : vector<2x128xf32> to vector<2x32xf32>
    %126 = math.tanh %125 : vector<2x32xf32>
    %127 = vector.extract_strided_slice %124 {offsets = [0, 0], sizes = [2, 32], strides = [1, 1]} : vector<2x96xf32> to vector<2x32xf32>
    %128 = vector.extract_strided_slice %124 {offsets = [0, 32], sizes = [2, 32], strides = [1, 1]} : vector<2x96xf32> to vector<2x32xf32>
    %129 = vector.extract_strided_slice %124 {offsets = [0, 64], sizes = [2, 32], strides = [1, 1]} : vector<2x96xf32> to vector<2x32xf32>
    %130 = arith.mulf %128, %113 : vector<2x32xf32>
    %131 = arith.mulf %127, %126 : vector<2x32xf32>
    %132 = arith.addf %130, %131 : vector<2x32xf32>
    %133 = math.tanh %132 : vector<2x32xf32>
    %134 = arith.mulf %129, %133 : vector<2x32xf32>
    %135 = vector.extract_strided_slice %6 {offsets = [14, 0], sizes = [2, 128], strides = [1, 1]} : vector<16x128xf32> to vector<2x128xf32>
    %cst_20 = arith.constant dense<0.000000e+00> : vector<2x128xf32>
    %136 = tpu.matmul %134, %1, %cst_20 {dimension_numbers = #tpu.dot_dimension_numbers<[1], [0], [0], [1], [0, 0, 1, 1], [], []>} : vector<2x32xf32>, vector<32x128xf32>, vector<2x128xf32> -> vector<2x128xf32>
    %137 = arith.addf %135, %136 : vector<2x128xf32>
    %138 = vector.extract_strided_slice %137 {offsets = [0, 0], sizes = [2, 96], strides = [1, 1]} : vector<2x128xf32> to vector<2x96xf32>
    %139 = arith.negf %138 : vector<2x96xf32>
    %140 = math.exp %139 : vector<2x96xf32>
    %cst_21 = arith.constant 1.000000e+00 : f32
    %141 = vector.broadcast %cst_21 : f32 to vector<2x96xf32>
    %142 = arith.addf %141, %140 : vector<2x96xf32>
    %143 = arith.divf %141, %142 : vector<2x96xf32>
    %144 = vector.extract_strided_slice %137 {offsets = [0, 96], sizes = [2, 32], strides = [1, 1]} : vector<2x128xf32> to vector<2x32xf32>
    %145 = math.tanh %144 : vector<2x32xf32>
    %146 = vector.extract_strided_slice %143 {offsets = [0, 0], sizes = [2, 32], strides = [1, 1]} : vector<2x96xf32> to vector<2x32xf32>
    %147 = vector.extract_strided_slice %143 {offsets = [0, 32], sizes = [2, 32], strides = [1, 1]} : vector<2x96xf32> to vector<2x32xf32>
    %148 = vector.extract_strided_slice %143 {offsets = [0, 64], sizes = [2, 32], strides = [1, 1]} : vector<2x96xf32> to vector<2x32xf32>
    %149 = arith.mulf %147, %132 : vector<2x32xf32>
    %150 = arith.mulf %146, %145 : vector<2x32xf32>
    %151 = arith.addf %149, %150 : vector<2x32xf32>
    %152 = math.tanh %151 : vector<2x32xf32>
    %153 = arith.mulf %148, %152 : vector<2x32xf32>
    %154 = tpu.concatenate %20, %39, %58, %77, %96, %115, %134, %153 in 0 : vector<2x32xf32>, vector<2x32xf32>, vector<2x32xf32>, vector<2x32xf32>, vector<2x32xf32>, vector<2x32xf32>, vector<2x32xf32>, vector<2x32xf32> -> vector<16x32xf32>
    %c0_22 = arith.constant 0 : index
    %c0_23 = arith.constant 0 : index
    %155 = vector.load %arg5[%c0_22, %c0_23] : memref<32x128xf32, #tpu.memory_space<vmem>>, vector<32x128xf32>
    %c0_24 = arith.constant 0 : index
    %c0_25 = arith.constant 0 : index
    %156 = vector.load %arg4[%c0_24, %c0_25] : memref<32x128xf32, #tpu.memory_space<vmem>>, vector<32x128xf32>
    %cst_26 = arith.constant dense<0.000000e+00> : vector<16x128xf32>
    %157 = tpu.matmul %154, %156, %cst_26 {dimension_numbers = #tpu.dot_dimension_numbers<[1], [0], [0], [1], [0, 0, 1, 1], [], []>} : vector<16x32xf32>, vector<32x128xf32>, vector<16x128xf32> -> vector<16x128xf32>
    %c0_27 = arith.constant 0 : index
    %c0_28 = arith.constant 0 : index
    %158 = vector.load %arg6[%c0_27, %c0_28] : memref<1x128xf32, #tpu.memory_space<vmem>>, vector<1x128xf32>
    %159 = vector.broadcast %158 : vector<1x128xf32> to vector<16x128xf32>
    %160 = arith.addf %157, %159 : vector<16x128xf32>
    %161 = vector.extract_strided_slice %160 {offsets = [0, 0], sizes = [2, 128], strides = [1, 1]} : vector<16x128xf32> to vector<2x128xf32>
    %162 = vector.extract_strided_slice %161 {offsets = [0, 0], sizes = [2, 96], strides = [1, 1]} : vector<2x128xf32> to vector<2x96xf32>
    %163 = arith.negf %162 : vector<2x96xf32>
    %164 = math.exp %163 : vector<2x96xf32>
    %cst_29 = arith.constant 1.000000e+00 : f32
    %165 = vector.broadcast %cst_29 : f32 to vector<2x96xf32>
    %166 = arith.addf %165, %164 : vector<2x96xf32>
    %167 = arith.divf %165, %166 : vector<2x96xf32>
    %168 = vector.extract_strided_slice %161 {offsets = [0, 96], sizes = [2, 32], strides = [1, 1]} : vector<2x128xf32> to vector<2x32xf32>
    %169 = math.tanh %168 : vector<2x32xf32>
    %170 = vector.extract_strided_slice %167 {offsets = [0, 0], sizes = [2, 32], strides = [1, 1]} : vector<2x96xf32> to vector<2x32xf32>
    %171 = vector.extract_strided_slice %167 {offsets = [0, 64], sizes = [2, 32], strides = [1, 1]} : vector<2x96xf32> to vector<2x32xf32>
    %172 = arith.mulf %170, %169 : vector<2x32xf32>
    %173 = math.tanh %172 : vector<2x32xf32>
    %174 = arith.mulf %171, %173 : vector<2x32xf32>
    %175 = vector.extract_strided_slice %160 {offsets = [2, 0], sizes = [2, 128], strides = [1, 1]} : vector<16x128xf32> to vector<2x128xf32>
    %176 = vector.extract_strided_slice %175 {offsets = [0, 0], sizes = [2, 96], strides = [1, 1]} : vector<2x128xf32> to vector<2x96xf32>
    %177 = arith.negf %176 : vector<2x96xf32>
    %178 = math.exp %177 : vector<2x96xf32>
    %cst_30 = arith.constant 1.000000e+00 : f32
    %179 = vector.broadcast %cst_30 : f32 to vector<2x96xf32>
    %180 = arith.addf %179, %178 : vector<2x96xf32>
    %181 = arith.divf %179, %180 : vector<2x96xf32>
    %182 = vector.extract_strided_slice %175 {offsets = [0, 96], sizes = [2, 32], strides = [1, 1]} : vector<2x128xf32> to vector<2x32xf32>
    %183 = math.tanh %182 : vector<2x32xf32>
    %184 = vector.extract_strided_slice %181 {offsets = [0, 0], sizes = [2, 32], strides = [1, 1]} : vector<2x96xf32> to vector<2x32xf32>
    %185 = vector.extract_strided_slice %181 {offsets = [0, 64], sizes = [2, 32], strides = [1, 1]} : vector<2x96xf32> to vector<2x32xf32>
    %186 = arith.mulf %184, %183 : vector<2x32xf32>
    %187 = math.tanh %186 : vector<2x32xf32>
    %188 = arith.mulf %185, %187 : vector<2x32xf32>
    %189 = vector.extract_strided_slice %160 {offsets = [4, 0], sizes = [2, 128], strides = [1, 1]} : vector<16x128xf32> to vector<2x128xf32>
    %cst_31 = arith.constant dense<0.000000e+00> : vector<2x128xf32>
    %190 = tpu.matmul %174, %155, %cst_31 {dimension_numbers = #tpu.dot_dimension_numbers<[1], [0], [0], [1], [0, 0, 1, 1], [], []>} : vector<2x32xf32>, vector<32x128xf32>, vector<2x128xf32> -> vector<2x128xf32>
    %191 = arith.addf %189, %190 : vector<2x128xf32>
    %192 = vector.extract_strided_slice %191 {offsets = [0, 0], sizes = [2, 96], strides = [1, 1]} : vector<2x128xf32> to vector<2x96xf32>
    %193 = arith.negf %192 : vector<2x96xf32>
    %194 = math.exp %193 : vector<2x96xf32>
    %cst_32 = arith.constant 1.000000e+00 : f32
    %195 = vector.broadcast %cst_32 : f32 to vector<2x96xf32>
    %196 = arith.addf %195, %194 : vector<2x96xf32>
    %197 = arith.divf %195, %196 : vector<2x96xf32>
    %198 = vector.extract_strided_slice %191 {offsets = [0, 96], sizes = [2, 32], strides = [1, 1]} : vector<2x128xf32> to vector<2x32xf32>
    %199 = math.tanh %198 : vector<2x32xf32>
    %200 = vector.extract_strided_slice %197 {offsets = [0, 0], sizes = [2, 32], strides = [1, 1]} : vector<2x96xf32> to vector<2x32xf32>
    %201 = vector.extract_strided_slice %197 {offsets = [0, 32], sizes = [2, 32], strides = [1, 1]} : vector<2x96xf32> to vector<2x32xf32>
    %202 = vector.extract_strided_slice %197 {offsets = [0, 64], sizes = [2, 32], strides = [1, 1]} : vector<2x96xf32> to vector<2x32xf32>
    %203 = arith.mulf %201, %172 : vector<2x32xf32>
    %204 = arith.mulf %200, %199 : vector<2x32xf32>
    %205 = arith.addf %203, %204 : vector<2x32xf32>
    %206 = math.tanh %205 : vector<2x32xf32>
    %207 = arith.mulf %202, %206 : vector<2x32xf32>
    %208 = vector.extract_strided_slice %160 {offsets = [6, 0], sizes = [2, 128], strides = [1, 1]} : vector<16x128xf32> to vector<2x128xf32>
    %cst_33 = arith.constant dense<0.000000e+00> : vector<2x128xf32>
    %209 = tpu.matmul %188, %155, %cst_33 {dimension_numbers = #tpu.dot_dimension_numbers<[1], [0], [0], [1], [0, 0, 1, 1], [], []>} : vector<2x32xf32>, vector<32x128xf32>, vector<2x128xf32> -> vector<2x128xf32>
    %210 = arith.addf %208, %209 : vector<2x128xf32>
    %211 = vector.extract_strided_slice %210 {offsets = [0, 0], sizes = [2, 96], strides = [1, 1]} : vector<2x128xf32> to vector<2x96xf32>
    %212 = arith.negf %211 : vector<2x96xf32>
    %213 = math.exp %212 : vector<2x96xf32>
    %cst_34 = arith.constant 1.000000e+00 : f32
    %214 = vector.broadcast %cst_34 : f32 to vector<2x96xf32>
    %215 = arith.addf %214, %213 : vector<2x96xf32>
    %216 = arith.divf %214, %215 : vector<2x96xf32>
    %217 = vector.extract_strided_slice %210 {offsets = [0, 96], sizes = [2, 32], strides = [1, 1]} : vector<2x128xf32> to vector<2x32xf32>
    %218 = math.tanh %217 : vector<2x32xf32>
    %219 = vector.extract_strided_slice %216 {offsets = [0, 0], sizes = [2, 32], strides = [1, 1]} : vector<2x96xf32> to vector<2x32xf32>
    %220 = vector.extract_strided_slice %216 {offsets = [0, 32], sizes = [2, 32], strides = [1, 1]} : vector<2x96xf32> to vector<2x32xf32>
    %221 = vector.extract_strided_slice %216 {offsets = [0, 64], sizes = [2, 32], strides = [1, 1]} : vector<2x96xf32> to vector<2x32xf32>
    %222 = arith.mulf %220, %186 : vector<2x32xf32>
    %223 = arith.mulf %219, %218 : vector<2x32xf32>
    %224 = arith.addf %222, %223 : vector<2x32xf32>
    %225 = math.tanh %224 : vector<2x32xf32>
    %226 = arith.mulf %221, %225 : vector<2x32xf32>
    %227 = vector.extract_strided_slice %160 {offsets = [8, 0], sizes = [2, 128], strides = [1, 1]} : vector<16x128xf32> to vector<2x128xf32>
    %cst_35 = arith.constant dense<0.000000e+00> : vector<2x128xf32>
    %228 = tpu.matmul %207, %155, %cst_35 {dimension_numbers = #tpu.dot_dimension_numbers<[1], [0], [0], [1], [0, 0, 1, 1], [], []>} : vector<2x32xf32>, vector<32x128xf32>, vector<2x128xf32> -> vector<2x128xf32>
    %229 = arith.addf %227, %228 : vector<2x128xf32>
    %230 = vector.extract_strided_slice %229 {offsets = [0, 0], sizes = [2, 96], strides = [1, 1]} : vector<2x128xf32> to vector<2x96xf32>
    %231 = arith.negf %230 : vector<2x96xf32>
    %232 = math.exp %231 : vector<2x96xf32>
    %cst_36 = arith.constant 1.000000e+00 : f32
    %233 = vector.broadcast %cst_36 : f32 to vector<2x96xf32>
    %234 = arith.addf %233, %232 : vector<2x96xf32>
    %235 = arith.divf %233, %234 : vector<2x96xf32>
    %236 = vector.extract_strided_slice %229 {offsets = [0, 96], sizes = [2, 32], strides = [1, 1]} : vector<2x128xf32> to vector<2x32xf32>
    %237 = math.tanh %236 : vector<2x32xf32>
    %238 = vector.extract_strided_slice %235 {offsets = [0, 0], sizes = [2, 32], strides = [1, 1]} : vector<2x96xf32> to vector<2x32xf32>
    %239 = vector.extract_strided_slice %235 {offsets = [0, 32], sizes = [2, 32], strides = [1, 1]} : vector<2x96xf32> to vector<2x32xf32>
    %240 = vector.extract_strided_slice %235 {offsets = [0, 64], sizes = [2, 32], strides = [1, 1]} : vector<2x96xf32> to vector<2x32xf32>
    %241 = arith.mulf %239, %205 : vector<2x32xf32>
    %242 = arith.mulf %238, %237 : vector<2x32xf32>
    %243 = arith.addf %241, %242 : vector<2x32xf32>
    %244 = math.tanh %243 : vector<2x32xf32>
    %245 = arith.mulf %240, %244 : vector<2x32xf32>
    %246 = vector.extract_strided_slice %160 {offsets = [10, 0], sizes = [2, 128], strides = [1, 1]} : vector<16x128xf32> to vector<2x128xf32>
    %cst_37 = arith.constant dense<0.000000e+00> : vector<2x128xf32>
    %247 = tpu.matmul %226, %155, %cst_37 {dimension_numbers = #tpu.dot_dimension_numbers<[1], [0], [0], [1], [0, 0, 1, 1], [], []>} : vector<2x32xf32>, vector<32x128xf32>, vector<2x128xf32> -> vector<2x128xf32>
    %248 = arith.addf %246, %247 : vector<2x128xf32>
    %249 = vector.extract_strided_slice %248 {offsets = [0, 0], sizes = [2, 96], strides = [1, 1]} : vector<2x128xf32> to vector<2x96xf32>
    %250 = arith.negf %249 : vector<2x96xf32>
    %251 = math.exp %250 : vector<2x96xf32>
    %cst_38 = arith.constant 1.000000e+00 : f32
    %252 = vector.broadcast %cst_38 : f32 to vector<2x96xf32>
    %253 = arith.addf %252, %251 : vector<2x96xf32>
    %254 = arith.divf %252, %253 : vector<2x96xf32>
    %255 = vector.extract_strided_slice %248 {offsets = [0, 96], sizes = [2, 32], strides = [1, 1]} : vector<2x128xf32> to vector<2x32xf32>
    %256 = math.tanh %255 : vector<2x32xf32>
    %257 = vector.extract_strided_slice %254 {offsets = [0, 0], sizes = [2, 32], strides = [1, 1]} : vector<2x96xf32> to vector<2x32xf32>
    %258 = vector.extract_strided_slice %254 {offsets = [0, 32], sizes = [2, 32], strides = [1, 1]} : vector<2x96xf32> to vector<2x32xf32>
    %259 = vector.extract_strided_slice %254 {offsets = [0, 64], sizes = [2, 32], strides = [1, 1]} : vector<2x96xf32> to vector<2x32xf32>
    %260 = arith.mulf %258, %224 : vector<2x32xf32>
    %261 = arith.mulf %257, %256 : vector<2x32xf32>
    %262 = arith.addf %260, %261 : vector<2x32xf32>
    %263 = math.tanh %262 : vector<2x32xf32>
    %264 = arith.mulf %259, %263 : vector<2x32xf32>
    %265 = vector.extract_strided_slice %160 {offsets = [12, 0], sizes = [2, 128], strides = [1, 1]} : vector<16x128xf32> to vector<2x128xf32>
    %cst_39 = arith.constant dense<0.000000e+00> : vector<2x128xf32>
    %266 = tpu.matmul %245, %155, %cst_39 {dimension_numbers = #tpu.dot_dimension_numbers<[1], [0], [0], [1], [0, 0, 1, 1], [], []>} : vector<2x32xf32>, vector<32x128xf32>, vector<2x128xf32> -> vector<2x128xf32>
    %267 = arith.addf %265, %266 : vector<2x128xf32>
    %268 = vector.extract_strided_slice %267 {offsets = [0, 0], sizes = [2, 96], strides = [1, 1]} : vector<2x128xf32> to vector<2x96xf32>
    %269 = arith.negf %268 : vector<2x96xf32>
    %270 = math.exp %269 : vector<2x96xf32>
    %cst_40 = arith.constant 1.000000e+00 : f32
    %271 = vector.broadcast %cst_40 : f32 to vector<2x96xf32>
    %272 = arith.addf %271, %270 : vector<2x96xf32>
    %273 = arith.divf %271, %272 : vector<2x96xf32>
    %274 = vector.extract_strided_slice %267 {offsets = [0, 96], sizes = [2, 32], strides = [1, 1]} : vector<2x128xf32> to vector<2x32xf32>
    %275 = math.tanh %274 : vector<2x32xf32>
    %276 = vector.extract_strided_slice %273 {offsets = [0, 0], sizes = [2, 32], strides = [1, 1]} : vector<2x96xf32> to vector<2x32xf32>
    %277 = vector.extract_strided_slice %273 {offsets = [0, 32], sizes = [2, 32], strides = [1, 1]} : vector<2x96xf32> to vector<2x32xf32>
    %278 = vector.extract_strided_slice %273 {offsets = [0, 64], sizes = [2, 32], strides = [1, 1]} : vector<2x96xf32> to vector<2x32xf32>
    %279 = arith.mulf %277, %243 : vector<2x32xf32>
    %280 = arith.mulf %276, %275 : vector<2x32xf32>
    %281 = arith.addf %279, %280 : vector<2x32xf32>
    %282 = math.tanh %281 : vector<2x32xf32>
    %283 = arith.mulf %278, %282 : vector<2x32xf32>
    %284 = vector.extract_strided_slice %160 {offsets = [14, 0], sizes = [2, 128], strides = [1, 1]} : vector<16x128xf32> to vector<2x128xf32>
    %cst_41 = arith.constant dense<0.000000e+00> : vector<2x128xf32>
    %285 = tpu.matmul %264, %155, %cst_41 {dimension_numbers = #tpu.dot_dimension_numbers<[1], [0], [0], [1], [0, 0, 1, 1], [], []>} : vector<2x32xf32>, vector<32x128xf32>, vector<2x128xf32> -> vector<2x128xf32>
    %286 = arith.addf %284, %285 : vector<2x128xf32>
    %287 = vector.extract_strided_slice %286 {offsets = [0, 0], sizes = [2, 96], strides = [1, 1]} : vector<2x128xf32> to vector<2x96xf32>
    %288 = arith.negf %287 : vector<2x96xf32>
    %289 = math.exp %288 : vector<2x96xf32>
    %cst_42 = arith.constant 1.000000e+00 : f32
    %290 = vector.broadcast %cst_42 : f32 to vector<2x96xf32>
    %291 = arith.addf %290, %289 : vector<2x96xf32>
    %292 = arith.divf %290, %291 : vector<2x96xf32>
    %293 = vector.extract_strided_slice %286 {offsets = [0, 96], sizes = [2, 32], strides = [1, 1]} : vector<2x128xf32> to vector<2x32xf32>
    %294 = math.tanh %293 : vector<2x32xf32>
    %295 = vector.extract_strided_slice %292 {offsets = [0, 0], sizes = [2, 32], strides = [1, 1]} : vector<2x96xf32> to vector<2x32xf32>
    %296 = vector.extract_strided_slice %292 {offsets = [0, 32], sizes = [2, 32], strides = [1, 1]} : vector<2x96xf32> to vector<2x32xf32>
    %297 = vector.extract_strided_slice %292 {offsets = [0, 64], sizes = [2, 32], strides = [1, 1]} : vector<2x96xf32> to vector<2x32xf32>
    %298 = arith.mulf %296, %262 : vector<2x32xf32>
    %299 = arith.mulf %295, %294 : vector<2x32xf32>
    %300 = arith.addf %298, %299 : vector<2x32xf32>
    %301 = math.tanh %300 : vector<2x32xf32>
    %302 = arith.mulf %297, %301 : vector<2x32xf32>
    %303 = tpu.concatenate %174, %188, %207, %226, %245, %264, %283, %302 in 0 : vector<2x32xf32>, vector<2x32xf32>, vector<2x32xf32>, vector<2x32xf32>, vector<2x32xf32>, vector<2x32xf32>, vector<2x32xf32>, vector<2x32xf32> -> vector<16x32xf32>
    %c0_43 = arith.constant 0 : index
    %c0_44 = arith.constant 0 : index
    %304 = vector.load %arg8[%c0_43, %c0_44] : memref<32x128xf32, #tpu.memory_space<vmem>>, vector<32x128xf32>
    %c0_45 = arith.constant 0 : index
    %c0_46 = arith.constant 0 : index
    %305 = vector.load %arg7[%c0_45, %c0_46] : memref<32x128xf32, #tpu.memory_space<vmem>>, vector<32x128xf32>
    %cst_47 = arith.constant dense<0.000000e+00> : vector<16x128xf32>
    %306 = tpu.matmul %303, %305, %cst_47 {dimension_numbers = #tpu.dot_dimension_numbers<[1], [0], [0], [1], [0, 0, 1, 1], [], []>} : vector<16x32xf32>, vector<32x128xf32>, vector<16x128xf32> -> vector<16x128xf32>
    %c0_48 = arith.constant 0 : index
    %c0_49 = arith.constant 0 : index
    %307 = vector.load %arg9[%c0_48, %c0_49] : memref<1x128xf32, #tpu.memory_space<vmem>>, vector<1x128xf32>
    %308 = vector.broadcast %307 : vector<1x128xf32> to vector<16x128xf32>
    %309 = arith.addf %306, %308 : vector<16x128xf32>
    %310 = vector.extract_strided_slice %309 {offsets = [0, 0], sizes = [2, 128], strides = [1, 1]} : vector<16x128xf32> to vector<2x128xf32>
    %311 = vector.extract_strided_slice %310 {offsets = [0, 0], sizes = [2, 96], strides = [1, 1]} : vector<2x128xf32> to vector<2x96xf32>
    %312 = arith.negf %311 : vector<2x96xf32>
    %313 = math.exp %312 : vector<2x96xf32>
    %cst_50 = arith.constant 1.000000e+00 : f32
    %314 = vector.broadcast %cst_50 : f32 to vector<2x96xf32>
    %315 = arith.addf %314, %313 : vector<2x96xf32>
    %316 = arith.divf %314, %315 : vector<2x96xf32>
    %317 = vector.extract_strided_slice %310 {offsets = [0, 96], sizes = [2, 32], strides = [1, 1]} : vector<2x128xf32> to vector<2x32xf32>
    %318 = math.tanh %317 : vector<2x32xf32>
    %319 = vector.extract_strided_slice %316 {offsets = [0, 0], sizes = [2, 32], strides = [1, 1]} : vector<2x96xf32> to vector<2x32xf32>
    %320 = vector.extract_strided_slice %316 {offsets = [0, 64], sizes = [2, 32], strides = [1, 1]} : vector<2x96xf32> to vector<2x32xf32>
    %321 = arith.mulf %319, %318 : vector<2x32xf32>
    %322 = math.tanh %321 : vector<2x32xf32>
    %323 = arith.mulf %320, %322 : vector<2x32xf32>
    %324 = vector.extract_strided_slice %309 {offsets = [2, 0], sizes = [2, 128], strides = [1, 1]} : vector<16x128xf32> to vector<2x128xf32>
    %325 = vector.extract_strided_slice %324 {offsets = [0, 0], sizes = [2, 96], strides = [1, 1]} : vector<2x128xf32> to vector<2x96xf32>
    %326 = arith.negf %325 : vector<2x96xf32>
    %327 = math.exp %326 : vector<2x96xf32>
    %cst_51 = arith.constant 1.000000e+00 : f32
    %328 = vector.broadcast %cst_51 : f32 to vector<2x96xf32>
    %329 = arith.addf %328, %327 : vector<2x96xf32>
    %330 = arith.divf %328, %329 : vector<2x96xf32>
    %331 = vector.extract_strided_slice %324 {offsets = [0, 96], sizes = [2, 32], strides = [1, 1]} : vector<2x128xf32> to vector<2x32xf32>
    %332 = math.tanh %331 : vector<2x32xf32>
    %333 = vector.extract_strided_slice %330 {offsets = [0, 0], sizes = [2, 32], strides = [1, 1]} : vector<2x96xf32> to vector<2x32xf32>
    %334 = vector.extract_strided_slice %330 {offsets = [0, 64], sizes = [2, 32], strides = [1, 1]} : vector<2x96xf32> to vector<2x32xf32>
    %335 = arith.mulf %333, %332 : vector<2x32xf32>
    %336 = math.tanh %335 : vector<2x32xf32>
    %337 = arith.mulf %334, %336 : vector<2x32xf32>
    %338 = vector.extract_strided_slice %309 {offsets = [4, 0], sizes = [2, 128], strides = [1, 1]} : vector<16x128xf32> to vector<2x128xf32>
    %cst_52 = arith.constant dense<0.000000e+00> : vector<2x128xf32>
    %339 = tpu.matmul %323, %304, %cst_52 {dimension_numbers = #tpu.dot_dimension_numbers<[1], [0], [0], [1], [0, 0, 1, 1], [], []>} : vector<2x32xf32>, vector<32x128xf32>, vector<2x128xf32> -> vector<2x128xf32>
    %340 = arith.addf %338, %339 : vector<2x128xf32>
    %341 = vector.extract_strided_slice %340 {offsets = [0, 0], sizes = [2, 96], strides = [1, 1]} : vector<2x128xf32> to vector<2x96xf32>
    %342 = arith.negf %341 : vector<2x96xf32>
    %343 = math.exp %342 : vector<2x96xf32>
    %cst_53 = arith.constant 1.000000e+00 : f32
    %344 = vector.broadcast %cst_53 : f32 to vector<2x96xf32>
    %345 = arith.addf %344, %343 : vector<2x96xf32>
    %346 = arith.divf %344, %345 : vector<2x96xf32>
    %347 = vector.extract_strided_slice %340 {offsets = [0, 96], sizes = [2, 32], strides = [1, 1]} : vector<2x128xf32> to vector<2x32xf32>
    %348 = math.tanh %347 : vector<2x32xf32>
    %349 = vector.extract_strided_slice %346 {offsets = [0, 0], sizes = [2, 32], strides = [1, 1]} : vector<2x96xf32> to vector<2x32xf32>
    %350 = vector.extract_strided_slice %346 {offsets = [0, 32], sizes = [2, 32], strides = [1, 1]} : vector<2x96xf32> to vector<2x32xf32>
    %351 = vector.extract_strided_slice %346 {offsets = [0, 64], sizes = [2, 32], strides = [1, 1]} : vector<2x96xf32> to vector<2x32xf32>
    %352 = arith.mulf %350, %321 : vector<2x32xf32>
    %353 = arith.mulf %349, %348 : vector<2x32xf32>
    %354 = arith.addf %352, %353 : vector<2x32xf32>
    %355 = math.tanh %354 : vector<2x32xf32>
    %356 = arith.mulf %351, %355 : vector<2x32xf32>
    %357 = vector.extract_strided_slice %309 {offsets = [6, 0], sizes = [2, 128], strides = [1, 1]} : vector<16x128xf32> to vector<2x128xf32>
    %cst_54 = arith.constant dense<0.000000e+00> : vector<2x128xf32>
    %358 = tpu.matmul %337, %304, %cst_54 {dimension_numbers = #tpu.dot_dimension_numbers<[1], [0], [0], [1], [0, 0, 1, 1], [], []>} : vector<2x32xf32>, vector<32x128xf32>, vector<2x128xf32> -> vector<2x128xf32>
    %359 = arith.addf %357, %358 : vector<2x128xf32>
    %360 = vector.extract_strided_slice %359 {offsets = [0, 0], sizes = [2, 96], strides = [1, 1]} : vector<2x128xf32> to vector<2x96xf32>
    %361 = arith.negf %360 : vector<2x96xf32>
    %362 = math.exp %361 : vector<2x96xf32>
    %cst_55 = arith.constant 1.000000e+00 : f32
    %363 = vector.broadcast %cst_55 : f32 to vector<2x96xf32>
    %364 = arith.addf %363, %362 : vector<2x96xf32>
    %365 = arith.divf %363, %364 : vector<2x96xf32>
    %366 = vector.extract_strided_slice %359 {offsets = [0, 96], sizes = [2, 32], strides = [1, 1]} : vector<2x128xf32> to vector<2x32xf32>
    %367 = math.tanh %366 : vector<2x32xf32>
    %368 = vector.extract_strided_slice %365 {offsets = [0, 0], sizes = [2, 32], strides = [1, 1]} : vector<2x96xf32> to vector<2x32xf32>
    %369 = vector.extract_strided_slice %365 {offsets = [0, 32], sizes = [2, 32], strides = [1, 1]} : vector<2x96xf32> to vector<2x32xf32>
    %370 = vector.extract_strided_slice %365 {offsets = [0, 64], sizes = [2, 32], strides = [1, 1]} : vector<2x96xf32> to vector<2x32xf32>
    %371 = arith.mulf %369, %335 : vector<2x32xf32>
    %372 = arith.mulf %368, %367 : vector<2x32xf32>
    %373 = arith.addf %371, %372 : vector<2x32xf32>
    %374 = math.tanh %373 : vector<2x32xf32>
    %375 = arith.mulf %370, %374 : vector<2x32xf32>
    %376 = vector.extract_strided_slice %309 {offsets = [8, 0], sizes = [2, 128], strides = [1, 1]} : vector<16x128xf32> to vector<2x128xf32>
    %cst_56 = arith.constant dense<0.000000e+00> : vector<2x128xf32>
    %377 = tpu.matmul %356, %304, %cst_56 {dimension_numbers = #tpu.dot_dimension_numbers<[1], [0], [0], [1], [0, 0, 1, 1], [], []>} : vector<2x32xf32>, vector<32x128xf32>, vector<2x128xf32> -> vector<2x128xf32>
    %378 = arith.addf %376, %377 : vector<2x128xf32>
    %379 = vector.extract_strided_slice %378 {offsets = [0, 0], sizes = [2, 96], strides = [1, 1]} : vector<2x128xf32> to vector<2x96xf32>
    %380 = arith.negf %379 : vector<2x96xf32>
    %381 = math.exp %380 : vector<2x96xf32>
    %cst_57 = arith.constant 1.000000e+00 : f32
    %382 = vector.broadcast %cst_57 : f32 to vector<2x96xf32>
    %383 = arith.addf %382, %381 : vector<2x96xf32>
    %384 = arith.divf %382, %383 : vector<2x96xf32>
    %385 = vector.extract_strided_slice %378 {offsets = [0, 96], sizes = [2, 32], strides = [1, 1]} : vector<2x128xf32> to vector<2x32xf32>
    %386 = math.tanh %385 : vector<2x32xf32>
    %387 = vector.extract_strided_slice %384 {offsets = [0, 0], sizes = [2, 32], strides = [1, 1]} : vector<2x96xf32> to vector<2x32xf32>
    %388 = vector.extract_strided_slice %384 {offsets = [0, 32], sizes = [2, 32], strides = [1, 1]} : vector<2x96xf32> to vector<2x32xf32>
    %389 = vector.extract_strided_slice %384 {offsets = [0, 64], sizes = [2, 32], strides = [1, 1]} : vector<2x96xf32> to vector<2x32xf32>
    %390 = arith.mulf %388, %354 : vector<2x32xf32>
    %391 = arith.mulf %387, %386 : vector<2x32xf32>
    %392 = arith.addf %390, %391 : vector<2x32xf32>
    %393 = math.tanh %392 : vector<2x32xf32>
    %394 = arith.mulf %389, %393 : vector<2x32xf32>
    %395 = vector.extract_strided_slice %309 {offsets = [10, 0], sizes = [2, 128], strides = [1, 1]} : vector<16x128xf32> to vector<2x128xf32>
    %cst_58 = arith.constant dense<0.000000e+00> : vector<2x128xf32>
    %396 = tpu.matmul %375, %304, %cst_58 {dimension_numbers = #tpu.dot_dimension_numbers<[1], [0], [0], [1], [0, 0, 1, 1], [], []>} : vector<2x32xf32>, vector<32x128xf32>, vector<2x128xf32> -> vector<2x128xf32>
    %397 = arith.addf %395, %396 : vector<2x128xf32>
    %398 = vector.extract_strided_slice %397 {offsets = [0, 0], sizes = [2, 96], strides = [1, 1]} : vector<2x128xf32> to vector<2x96xf32>
    %399 = arith.negf %398 : vector<2x96xf32>
    %400 = math.exp %399 : vector<2x96xf32>
    %cst_59 = arith.constant 1.000000e+00 : f32
    %401 = vector.broadcast %cst_59 : f32 to vector<2x96xf32>
    %402 = arith.addf %401, %400 : vector<2x96xf32>
    %403 = arith.divf %401, %402 : vector<2x96xf32>
    %404 = vector.extract_strided_slice %397 {offsets = [0, 96], sizes = [2, 32], strides = [1, 1]} : vector<2x128xf32> to vector<2x32xf32>
    %405 = math.tanh %404 : vector<2x32xf32>
    %406 = vector.extract_strided_slice %403 {offsets = [0, 0], sizes = [2, 32], strides = [1, 1]} : vector<2x96xf32> to vector<2x32xf32>
    %407 = vector.extract_strided_slice %403 {offsets = [0, 32], sizes = [2, 32], strides = [1, 1]} : vector<2x96xf32> to vector<2x32xf32>
    %408 = vector.extract_strided_slice %403 {offsets = [0, 64], sizes = [2, 32], strides = [1, 1]} : vector<2x96xf32> to vector<2x32xf32>
    %409 = arith.mulf %407, %373 : vector<2x32xf32>
    %410 = arith.mulf %406, %405 : vector<2x32xf32>
    %411 = arith.addf %409, %410 : vector<2x32xf32>
    %412 = math.tanh %411 : vector<2x32xf32>
    %413 = arith.mulf %408, %412 : vector<2x32xf32>
    %414 = vector.extract_strided_slice %309 {offsets = [12, 0], sizes = [2, 128], strides = [1, 1]} : vector<16x128xf32> to vector<2x128xf32>
    %cst_60 = arith.constant dense<0.000000e+00> : vector<2x128xf32>
    %415 = tpu.matmul %394, %304, %cst_60 {dimension_numbers = #tpu.dot_dimension_numbers<[1], [0], [0], [1], [0, 0, 1, 1], [], []>} : vector<2x32xf32>, vector<32x128xf32>, vector<2x128xf32> -> vector<2x128xf32>
    %416 = arith.addf %414, %415 : vector<2x128xf32>
    %417 = vector.extract_strided_slice %416 {offsets = [0, 0], sizes = [2, 96], strides = [1, 1]} : vector<2x128xf32> to vector<2x96xf32>
    %418 = arith.negf %417 : vector<2x96xf32>
    %419 = math.exp %418 : vector<2x96xf32>
    %cst_61 = arith.constant 1.000000e+00 : f32
    %420 = vector.broadcast %cst_61 : f32 to vector<2x96xf32>
    %421 = arith.addf %420, %419 : vector<2x96xf32>
    %422 = arith.divf %420, %421 : vector<2x96xf32>
    %423 = vector.extract_strided_slice %416 {offsets = [0, 96], sizes = [2, 32], strides = [1, 1]} : vector<2x128xf32> to vector<2x32xf32>
    %424 = math.tanh %423 : vector<2x32xf32>
    %425 = vector.extract_strided_slice %422 {offsets = [0, 0], sizes = [2, 32], strides = [1, 1]} : vector<2x96xf32> to vector<2x32xf32>
    %426 = vector.extract_strided_slice %422 {offsets = [0, 32], sizes = [2, 32], strides = [1, 1]} : vector<2x96xf32> to vector<2x32xf32>
    %427 = vector.extract_strided_slice %422 {offsets = [0, 64], sizes = [2, 32], strides = [1, 1]} : vector<2x96xf32> to vector<2x32xf32>
    %428 = arith.mulf %426, %392 : vector<2x32xf32>
    %429 = arith.mulf %425, %424 : vector<2x32xf32>
    %430 = arith.addf %428, %429 : vector<2x32xf32>
    %431 = math.tanh %430 : vector<2x32xf32>
    %432 = arith.mulf %427, %431 : vector<2x32xf32>
    %433 = vector.extract_strided_slice %309 {offsets = [14, 0], sizes = [2, 128], strides = [1, 1]} : vector<16x128xf32> to vector<2x128xf32>
    %cst_62 = arith.constant dense<0.000000e+00> : vector<2x128xf32>
    %434 = tpu.matmul %413, %304, %cst_62 {dimension_numbers = #tpu.dot_dimension_numbers<[1], [0], [0], [1], [0, 0, 1, 1], [], []>} : vector<2x32xf32>, vector<32x128xf32>, vector<2x128xf32> -> vector<2x128xf32>
    %435 = arith.addf %433, %434 : vector<2x128xf32>
    %436 = vector.extract_strided_slice %435 {offsets = [0, 0], sizes = [2, 96], strides = [1, 1]} : vector<2x128xf32> to vector<2x96xf32>
    %437 = arith.negf %436 : vector<2x96xf32>
    %438 = math.exp %437 : vector<2x96xf32>
    %cst_63 = arith.constant 1.000000e+00 : f32
    %439 = vector.broadcast %cst_63 : f32 to vector<2x96xf32>
    %440 = arith.addf %439, %438 : vector<2x96xf32>
    %441 = arith.divf %439, %440 : vector<2x96xf32>
    %442 = vector.extract_strided_slice %435 {offsets = [0, 96], sizes = [2, 32], strides = [1, 1]} : vector<2x128xf32> to vector<2x32xf32>
    %443 = math.tanh %442 : vector<2x32xf32>
    %444 = vector.extract_strided_slice %441 {offsets = [0, 0], sizes = [2, 32], strides = [1, 1]} : vector<2x96xf32> to vector<2x32xf32>
    %445 = vector.extract_strided_slice %441 {offsets = [0, 32], sizes = [2, 32], strides = [1, 1]} : vector<2x96xf32> to vector<2x32xf32>
    %446 = vector.extract_strided_slice %441 {offsets = [0, 64], sizes = [2, 32], strides = [1, 1]} : vector<2x96xf32> to vector<2x32xf32>
    %447 = arith.mulf %445, %411 : vector<2x32xf32>
    %448 = arith.mulf %444, %443 : vector<2x32xf32>
    %449 = arith.addf %447, %448 : vector<2x32xf32>
    %450 = math.tanh %449 : vector<2x32xf32>
    %451 = arith.mulf %446, %450 : vector<2x32xf32>
    %452 = tpu.concatenate %323, %337, %356, %375, %394, %413, %432, %451 in 0 : vector<2x32xf32>, vector<2x32xf32>, vector<2x32xf32>, vector<2x32xf32>, vector<2x32xf32>, vector<2x32xf32>, vector<2x32xf32>, vector<2x32xf32> -> vector<16x32xf32>
    %c0_64 = arith.constant 0 : index
    %c0_65 = arith.constant 0 : index
    %453 = vector.load %arg11[%c0_64, %c0_65] : memref<32x128xf32, #tpu.memory_space<vmem>>, vector<32x128xf32>
    %c0_66 = arith.constant 0 : index
    %c0_67 = arith.constant 0 : index
    %454 = vector.load %arg10[%c0_66, %c0_67] : memref<32x128xf32, #tpu.memory_space<vmem>>, vector<32x128xf32>
    %cst_68 = arith.constant dense<0.000000e+00> : vector<16x128xf32>
    %455 = tpu.matmul %452, %454, %cst_68 {dimension_numbers = #tpu.dot_dimension_numbers<[1], [0], [0], [1], [0, 0, 1, 1], [], []>} : vector<16x32xf32>, vector<32x128xf32>, vector<16x128xf32> -> vector<16x128xf32>
    %c0_69 = arith.constant 0 : index
    %c0_70 = arith.constant 0 : index
    %456 = vector.load %arg12[%c0_69, %c0_70] : memref<1x128xf32, #tpu.memory_space<vmem>>, vector<1x128xf32>
    %457 = vector.broadcast %456 : vector<1x128xf32> to vector<16x128xf32>
    %458 = arith.addf %455, %457 : vector<16x128xf32>
    %459 = vector.extract_strided_slice %458 {offsets = [0, 0], sizes = [2, 128], strides = [1, 1]} : vector<16x128xf32> to vector<2x128xf32>
    %460 = vector.extract_strided_slice %459 {offsets = [0, 0], sizes = [2, 96], strides = [1, 1]} : vector<2x128xf32> to vector<2x96xf32>
    %461 = arith.negf %460 : vector<2x96xf32>
    %462 = math.exp %461 : vector<2x96xf32>
    %cst_71 = arith.constant 1.000000e+00 : f32
    %463 = vector.broadcast %cst_71 : f32 to vector<2x96xf32>
    %464 = arith.addf %463, %462 : vector<2x96xf32>
    %465 = arith.divf %463, %464 : vector<2x96xf32>
    %466 = vector.extract_strided_slice %459 {offsets = [0, 96], sizes = [2, 32], strides = [1, 1]} : vector<2x128xf32> to vector<2x32xf32>
    %467 = math.tanh %466 : vector<2x32xf32>
    %468 = vector.extract_strided_slice %465 {offsets = [0, 0], sizes = [2, 32], strides = [1, 1]} : vector<2x96xf32> to vector<2x32xf32>
    %469 = vector.extract_strided_slice %465 {offsets = [0, 64], sizes = [2, 32], strides = [1, 1]} : vector<2x96xf32> to vector<2x32xf32>
    %470 = arith.mulf %468, %467 : vector<2x32xf32>
    %471 = math.tanh %470 : vector<2x32xf32>
    %472 = arith.mulf %469, %471 : vector<2x32xf32>
    %473 = vector.extract_strided_slice %458 {offsets = [2, 0], sizes = [2, 128], strides = [1, 1]} : vector<16x128xf32> to vector<2x128xf32>
    %474 = vector.extract_strided_slice %473 {offsets = [0, 0], sizes = [2, 96], strides = [1, 1]} : vector<2x128xf32> to vector<2x96xf32>
    %475 = arith.negf %474 : vector<2x96xf32>
    %476 = math.exp %475 : vector<2x96xf32>
    %cst_72 = arith.constant 1.000000e+00 : f32
    %477 = vector.broadcast %cst_72 : f32 to vector<2x96xf32>
    %478 = arith.addf %477, %476 : vector<2x96xf32>
    %479 = arith.divf %477, %478 : vector<2x96xf32>
    %480 = vector.extract_strided_slice %473 {offsets = [0, 96], sizes = [2, 32], strides = [1, 1]} : vector<2x128xf32> to vector<2x32xf32>
    %481 = math.tanh %480 : vector<2x32xf32>
    %482 = vector.extract_strided_slice %479 {offsets = [0, 0], sizes = [2, 32], strides = [1, 1]} : vector<2x96xf32> to vector<2x32xf32>
    %483 = vector.extract_strided_slice %479 {offsets = [0, 64], sizes = [2, 32], strides = [1, 1]} : vector<2x96xf32> to vector<2x32xf32>
    %484 = arith.mulf %482, %481 : vector<2x32xf32>
    %485 = math.tanh %484 : vector<2x32xf32>
    %486 = arith.mulf %483, %485 : vector<2x32xf32>
    %487 = vector.extract_strided_slice %458 {offsets = [4, 0], sizes = [2, 128], strides = [1, 1]} : vector<16x128xf32> to vector<2x128xf32>
    %488 = vector.extract_strided_slice %487 {offsets = [0, 0], sizes = [2, 96], strides = [1, 1]} : vector<2x128xf32> to vector<2x96xf32>
    %489 = arith.negf %488 : vector<2x96xf32>
    %490 = math.exp %489 : vector<2x96xf32>
    %cst_73 = arith.constant 1.000000e+00 : f32
    %491 = vector.broadcast %cst_73 : f32 to vector<2x96xf32>
    %492 = arith.addf %491, %490 : vector<2x96xf32>
    %493 = arith.divf %491, %492 : vector<2x96xf32>
    %494 = vector.extract_strided_slice %487 {offsets = [0, 96], sizes = [2, 32], strides = [1, 1]} : vector<2x128xf32> to vector<2x32xf32>
    %495 = math.tanh %494 : vector<2x32xf32>
    %496 = vector.extract_strided_slice %493 {offsets = [0, 0], sizes = [2, 32], strides = [1, 1]} : vector<2x96xf32> to vector<2x32xf32>
    %497 = vector.extract_strided_slice %493 {offsets = [0, 64], sizes = [2, 32], strides = [1, 1]} : vector<2x96xf32> to vector<2x32xf32>
    %498 = arith.mulf %496, %495 : vector<2x32xf32>
    %499 = math.tanh %498 : vector<2x32xf32>
    %500 = arith.mulf %497, %499 : vector<2x32xf32>
    %501 = vector.extract_strided_slice %458 {offsets = [6, 0], sizes = [2, 128], strides = [1, 1]} : vector<16x128xf32> to vector<2x128xf32>
    %502 = vector.extract_strided_slice %501 {offsets = [0, 0], sizes = [2, 96], strides = [1, 1]} : vector<2x128xf32> to vector<2x96xf32>
    %503 = arith.negf %502 : vector<2x96xf32>
    %504 = math.exp %503 : vector<2x96xf32>
    %cst_74 = arith.constant 1.000000e+00 : f32
    %505 = vector.broadcast %cst_74 : f32 to vector<2x96xf32>
    %506 = arith.addf %505, %504 : vector<2x96xf32>
    %507 = arith.divf %505, %506 : vector<2x96xf32>
    %508 = vector.extract_strided_slice %501 {offsets = [0, 96], sizes = [2, 32], strides = [1, 1]} : vector<2x128xf32> to vector<2x32xf32>
    %509 = math.tanh %508 : vector<2x32xf32>
    %510 = vector.extract_strided_slice %507 {offsets = [0, 0], sizes = [2, 32], strides = [1, 1]} : vector<2x96xf32> to vector<2x32xf32>
    %511 = vector.extract_strided_slice %507 {offsets = [0, 64], sizes = [2, 32], strides = [1, 1]} : vector<2x96xf32> to vector<2x32xf32>
    %512 = arith.mulf %510, %509 : vector<2x32xf32>
    %513 = math.tanh %512 : vector<2x32xf32>
    %514 = arith.mulf %511, %513 : vector<2x32xf32>
    %515 = vector.extract_strided_slice %458 {offsets = [8, 0], sizes = [2, 128], strides = [1, 1]} : vector<16x128xf32> to vector<2x128xf32>
    %cst_75 = arith.constant dense<0.000000e+00> : vector<2x128xf32>
    %516 = tpu.matmul %472, %453, %cst_75 {dimension_numbers = #tpu.dot_dimension_numbers<[1], [0], [0], [1], [0, 0, 1, 1], [], []>} : vector<2x32xf32>, vector<32x128xf32>, vector<2x128xf32> -> vector<2x128xf32>
    %517 = arith.addf %515, %516 : vector<2x128xf32>
    %518 = vector.extract_strided_slice %517 {offsets = [0, 0], sizes = [2, 96], strides = [1, 1]} : vector<2x128xf32> to vector<2x96xf32>
    %519 = arith.negf %518 : vector<2x96xf32>
    %520 = math.exp %519 : vector<2x96xf32>
    %cst_76 = arith.constant 1.000000e+00 : f32
    %521 = vector.broadcast %cst_76 : f32 to vector<2x96xf32>
    %522 = arith.addf %521, %520 : vector<2x96xf32>
    %523 = arith.divf %521, %522 : vector<2x96xf32>
    %524 = vector.extract_strided_slice %517 {offsets = [0, 96], sizes = [2, 32], strides = [1, 1]} : vector<2x128xf32> to vector<2x32xf32>
    %525 = math.tanh %524 : vector<2x32xf32>
    %526 = vector.extract_strided_slice %523 {offsets = [0, 0], sizes = [2, 32], strides = [1, 1]} : vector<2x96xf32> to vector<2x32xf32>
    %527 = vector.extract_strided_slice %523 {offsets = [0, 32], sizes = [2, 32], strides = [1, 1]} : vector<2x96xf32> to vector<2x32xf32>
    %528 = vector.extract_strided_slice %523 {offsets = [0, 64], sizes = [2, 32], strides = [1, 1]} : vector<2x96xf32> to vector<2x32xf32>
    %529 = arith.mulf %527, %470 : vector<2x32xf32>
    %530 = arith.mulf %526, %525 : vector<2x32xf32>
    %531 = arith.addf %529, %530 : vector<2x32xf32>
    %532 = math.tanh %531 : vector<2x32xf32>
    %533 = arith.mulf %528, %532 : vector<2x32xf32>
    %534 = vector.extract_strided_slice %458 {offsets = [10, 0], sizes = [2, 128], strides = [1, 1]} : vector<16x128xf32> to vector<2x128xf32>
    %cst_77 = arith.constant dense<0.000000e+00> : vector<2x128xf32>
    %535 = tpu.matmul %486, %453, %cst_77 {dimension_numbers = #tpu.dot_dimension_numbers<[1], [0], [0], [1], [0, 0, 1, 1], [], []>} : vector<2x32xf32>, vector<32x128xf32>, vector<2x128xf32> -> vector<2x128xf32>
    %536 = arith.addf %534, %535 : vector<2x128xf32>
    %537 = vector.extract_strided_slice %536 {offsets = [0, 0], sizes = [2, 96], strides = [1, 1]} : vector<2x128xf32> to vector<2x96xf32>
    %538 = arith.negf %537 : vector<2x96xf32>
    %539 = math.exp %538 : vector<2x96xf32>
    %cst_78 = arith.constant 1.000000e+00 : f32
    %540 = vector.broadcast %cst_78 : f32 to vector<2x96xf32>
    %541 = arith.addf %540, %539 : vector<2x96xf32>
    %542 = arith.divf %540, %541 : vector<2x96xf32>
    %543 = vector.extract_strided_slice %536 {offsets = [0, 96], sizes = [2, 32], strides = [1, 1]} : vector<2x128xf32> to vector<2x32xf32>
    %544 = math.tanh %543 : vector<2x32xf32>
    %545 = vector.extract_strided_slice %542 {offsets = [0, 0], sizes = [2, 32], strides = [1, 1]} : vector<2x96xf32> to vector<2x32xf32>
    %546 = vector.extract_strided_slice %542 {offsets = [0, 32], sizes = [2, 32], strides = [1, 1]} : vector<2x96xf32> to vector<2x32xf32>
    %547 = vector.extract_strided_slice %542 {offsets = [0, 64], sizes = [2, 32], strides = [1, 1]} : vector<2x96xf32> to vector<2x32xf32>
    %548 = arith.mulf %546, %484 : vector<2x32xf32>
    %549 = arith.mulf %545, %544 : vector<2x32xf32>
    %550 = arith.addf %548, %549 : vector<2x32xf32>
    %551 = math.tanh %550 : vector<2x32xf32>
    %552 = arith.mulf %547, %551 : vector<2x32xf32>
    %553 = vector.extract_strided_slice %458 {offsets = [12, 0], sizes = [2, 128], strides = [1, 1]} : vector<16x128xf32> to vector<2x128xf32>
    %cst_79 = arith.constant dense<0.000000e+00> : vector<2x128xf32>
    %554 = tpu.matmul %500, %453, %cst_79 {dimension_numbers = #tpu.dot_dimension_numbers<[1], [0], [0], [1], [0, 0, 1, 1], [], []>} : vector<2x32xf32>, vector<32x128xf32>, vector<2x128xf32> -> vector<2x128xf32>
    %555 = arith.addf %553, %554 : vector<2x128xf32>
    %556 = vector.extract_strided_slice %555 {offsets = [0, 0], sizes = [2, 96], strides = [1, 1]} : vector<2x128xf32> to vector<2x96xf32>
    %557 = arith.negf %556 : vector<2x96xf32>
    %558 = math.exp %557 : vector<2x96xf32>
    %cst_80 = arith.constant 1.000000e+00 : f32
    %559 = vector.broadcast %cst_80 : f32 to vector<2x96xf32>
    %560 = arith.addf %559, %558 : vector<2x96xf32>
    %561 = arith.divf %559, %560 : vector<2x96xf32>
    %562 = vector.extract_strided_slice %555 {offsets = [0, 96], sizes = [2, 32], strides = [1, 1]} : vector<2x128xf32> to vector<2x32xf32>
    %563 = math.tanh %562 : vector<2x32xf32>
    %564 = vector.extract_strided_slice %561 {offsets = [0, 0], sizes = [2, 32], strides = [1, 1]} : vector<2x96xf32> to vector<2x32xf32>
    %565 = vector.extract_strided_slice %561 {offsets = [0, 32], sizes = [2, 32], strides = [1, 1]} : vector<2x96xf32> to vector<2x32xf32>
    %566 = vector.extract_strided_slice %561 {offsets = [0, 64], sizes = [2, 32], strides = [1, 1]} : vector<2x96xf32> to vector<2x32xf32>
    %567 = arith.mulf %565, %498 : vector<2x32xf32>
    %568 = arith.mulf %564, %563 : vector<2x32xf32>
    %569 = arith.addf %567, %568 : vector<2x32xf32>
    %570 = math.tanh %569 : vector<2x32xf32>
    %571 = arith.mulf %566, %570 : vector<2x32xf32>
    %572 = vector.extract_strided_slice %458 {offsets = [14, 0], sizes = [2, 128], strides = [1, 1]} : vector<16x128xf32> to vector<2x128xf32>
    %cst_81 = arith.constant dense<0.000000e+00> : vector<2x128xf32>
    %573 = tpu.matmul %514, %453, %cst_81 {dimension_numbers = #tpu.dot_dimension_numbers<[1], [0], [0], [1], [0, 0, 1, 1], [], []>} : vector<2x32xf32>, vector<32x128xf32>, vector<2x128xf32> -> vector<2x128xf32>
    %574 = arith.addf %572, %573 : vector<2x128xf32>
    %575 = vector.extract_strided_slice %574 {offsets = [0, 0], sizes = [2, 96], strides = [1, 1]} : vector<2x128xf32> to vector<2x96xf32>
    %576 = arith.negf %575 : vector<2x96xf32>
    %577 = math.exp %576 : vector<2x96xf32>
    %cst_82 = arith.constant 1.000000e+00 : f32
    %578 = vector.broadcast %cst_82 : f32 to vector<2x96xf32>
    %579 = arith.addf %578, %577 : vector<2x96xf32>
    %580 = arith.divf %578, %579 : vector<2x96xf32>
    %581 = vector.extract_strided_slice %574 {offsets = [0, 96], sizes = [2, 32], strides = [1, 1]} : vector<2x128xf32> to vector<2x32xf32>
    %582 = math.tanh %581 : vector<2x32xf32>
    %583 = vector.extract_strided_slice %580 {offsets = [0, 0], sizes = [2, 32], strides = [1, 1]} : vector<2x96xf32> to vector<2x32xf32>
    %584 = vector.extract_strided_slice %580 {offsets = [0, 32], sizes = [2, 32], strides = [1, 1]} : vector<2x96xf32> to vector<2x32xf32>
    %585 = vector.extract_strided_slice %580 {offsets = [0, 64], sizes = [2, 32], strides = [1, 1]} : vector<2x96xf32> to vector<2x32xf32>
    %586 = arith.mulf %584, %512 : vector<2x32xf32>
    %587 = arith.mulf %583, %582 : vector<2x32xf32>
    %588 = arith.addf %586, %587 : vector<2x32xf32>
    %589 = math.tanh %588 : vector<2x32xf32>
    %590 = arith.mulf %585, %589 : vector<2x32xf32>
    %591 = tpu.concatenate %472, %486, %500, %514, %533, %552, %571, %590 in 0 : vector<2x32xf32>, vector<2x32xf32>, vector<2x32xf32>, vector<2x32xf32>, vector<2x32xf32>, vector<2x32xf32>, vector<2x32xf32>, vector<2x32xf32> -> vector<16x32xf32>
    %592 = arith.addf %591, %303 : vector<16x32xf32>
    %c0_83 = arith.constant 0 : index
    %c0_84 = arith.constant 0 : index
    %593 = vector.load %arg13[%c0_83, %c0_84] : memref<32x32xf32, #tpu.memory_space<vmem>>, vector<32x32xf32>
    %cst_85 = arith.constant dense<0.000000e+00> : vector<16x32xf32>
    %594 = tpu.matmul %592, %593, %cst_85 {dimension_numbers = #tpu.dot_dimension_numbers<[1], [0], [0], [1], [0, 0, 1, 1], [], []>} : vector<16x32xf32>, vector<32x32xf32>, vector<16x32xf32> -> vector<16x32xf32>
    %c0_86 = arith.constant 0 : index
    %c0_87 = arith.constant 0 : index
    %595 = vector.load %arg14[%c0_86, %c0_87] : memref<1x32xf32, #tpu.memory_space<vmem>>, vector<1x32xf32>
    %596 = vector.broadcast %595 : vector<1x32xf32> to vector<16x32xf32>
    %597 = arith.addf %594, %596 : vector<16x32xf32>
    %598 = math.tanh %597 : vector<16x32xf32>
    %c0_88 = arith.constant 0 : index
    %c0_89 = arith.constant 0 : index
    %599 = vector.load %arg15[%c0_88, %c0_89] : memref<32x128xf32, #tpu.memory_space<vmem>>, vector<32x128xf32>
    %cst_90 = arith.constant dense<0.000000e+00> : vector<16x128xf32>
    %600 = tpu.matmul %598, %599, %cst_90 {dimension_numbers = #tpu.dot_dimension_numbers<[1], [0], [0], [1], [0, 0, 1, 1], [], []>} : vector<16x32xf32>, vector<32x128xf32>, vector<16x128xf32> -> vector<16x128xf32>
    %c0_91 = arith.constant 0 : index
    %c0_92 = arith.constant 0 : index
    %601 = vector.load %arg16[%c0_91, %c0_92] : memref<1x128xf32, #tpu.memory_space<vmem>>, vector<1x128xf32>
    %602 = vector.broadcast %601 : vector<1x128xf32> to vector<16x128xf32>
    %603 = arith.addf %600, %602 : vector<16x128xf32>
    %c0_93 = arith.constant 0 : index
    %c0_94 = arith.constant 0 : index
    %604 = vector.load %arg17[%c0_93, %c0_94] : memref<16x128xf32, #tpu.memory_space<vmem>>, vector<16x128xf32>
    tpu.vector_store %arg17[%c0_93, %c0_94], %603 {strides = array<i32>} : memref<16x128xf32, #tpu.memory_space<vmem>>, vector<16x128xf32>,
    return
  }
}

</mosaic_0001>

<bundles_post_ra>
// kernel: _lambda_.1
= control target key start
LH: loop header
LB: loop body
LE: loop exit
PB: predicated region body
PF: predicated region fallthrough
CT: control target
= control target key end

     0   :  { %s5068_s0 = inlined_call_operand.vmem [shape: f32[16,6], index: 0, kind: input, shape index: {}]   ;;  %s5069_s1 = inlined_call_operand.hbm [shape: f32[6,128], index: 1, kind: input, shape index: {}]   ;;  %s5070_s2 = inlined_call_operand.vmem [shape: f32[32,128], index: 2, kind: input, shape index: {}]   ;;  %s5071_s3 = inlined_call_operand.vmem [shape: f32[1,128], index: 3, kind: input, shape index: {}]   ;;  %s5072_s4 = inlined_call_operand.vmem [shape: f32[32,128], index: 4, kind: input, shape index: {}]   ;;  %s5073_s5 = inlined_call_operand.vmem [shape: f32[32,128], index: 5, kind: input, shape index: {}]   ;;  %s5074_s6 = inlined_call_operand.vmem [shape: f32[1,128], index: 6, kind: input, shape index: {}]   ;;  %s5075_s7 = inlined_call_operand.vmem [shape: f32[32,128], index: 7, kind: input, shape index: {}]   ;;  %s5076_s8 = inlined_call_operand.vmem [shape: f32[32,128], index: 8, kind: input, shape index: {}]   ;;  %s5077_s9 = inlined_call_operand.hbm [shape: f32[1,128], index: 9, kind: input, shape index: {}]   ;;  %s5078_s10 = inlined_call_operand.hbm [shape: f32[32,128], index: 10, kind: input, shape index: {}]   ;;  %s5079_s11 = inlined_call_operand.hbm [shape: f32[32,128], index: 11, kind: input, shape index: {}]   ;;  %s5080_s12 = inlined_call_operand.hbm [shape: f32[1,128], index: 12, kind: input, shape index: {}]   ;;  %s5081_s13 = inlined_call_operand.hbm [shape: f32[32,32], index: 13, kind: input, shape index: {}]   ;;  %s5082_s14 = inlined_call_operand.hbm [shape: f32[1,32], index: 14, kind: input, shape index: {}]   ;;  %s5083_s15 = inlined_call_operand.vmem [shape: f32[32,128], index: 15, kind: input, shape index: {}]   ;;  %s5084_s16 = inlined_call_operand.vmem [shape: f32[1,128], index: 16, kind: input, shape index: {}]   ;;  %s5085_s17 = inlined_call_operand.vmem [shape: f32[16,128], index: 17, kind: output, shape index: {}]  }
   0x1   :  { %5088 = sst [smem:[#allocation17_spill]] %s5068_s0 }
   0x2   :  { %5089 = sst [smem:[#allocation18_spill]] %s5069_s1 }
   0x3   :  { %22 = vsyncpa [#allocation3], 0 }
   0x4   :  { %23 = vsyncpa [#allocation5], 0 }
   0x5   :  { %24 = vsyncpa [#allocation8], 0 }
   0x6   :  { %25 = vsyncpa [#allocation11], 0  ;;  %s4374_s24 = smov [#allocation4]   ;;  %s4212_s28 = scalar_lea.hbm %s5077_s9, 16 }
   0x7   :  { %s58_s25 = sshll.u32 %s4374_s24, 4  ;;  %p4213_p0 = scmp.ne.s32.totalorder %s5077_s9, %s4212_s28  ;;  %s59_s25 = int_to_ptr.vmem [resolvable:$true] %s58_s25 }
   0x8   :  { %p4216_p1 = scmp.lt.u32.totalorder %s4212_s28, %s5077_s9 }
   0xa   :  { %p4218_p2 = pnand %p4216_p1, %p4213_p0 }
   0xc   :  { %4221 = shalt.err (!%p4218_p2)
}
   0xd   :  { %s4222_s19 = scalar_lea.vmem %s59_s25, 16  ;;  %s4226_s1 = scalar_lea.vmem %s59_s25, 32 }
   0xe   :  { %p4223_p3 = scmp.ne.s32.totalorder %s59_s25, %s4222_s19  ;;  %p4227_p4 = scmp.lt.s32.totalorder %s59_s25, %s59_s25 }
   0xf   :  { %p4228_p5 = scmp.lt.s32.totalorder %s4226_s1, %s4222_s19 }
  0x11   :  { %p4229_p6 = por %p4228_p5, %p4227_p4 }
  0x13   :  { %p4230_p7 = pnand %p4229_p6, %p4223_p3 }
  0x15   :  { %4233 = shalt.err (!%p4230_p7)
}
  0x16   :  { %61 = dma.hbm_to_vmem [thread:$0]  %s5077_s9, 16, %s59_s25, [#allocation5]  }
  0x17   :  { %s4375_s22 = smov [#allocation7]   ;;  %s4376_s24 = smov [#allocation10]  }
  0x18   :  { %s79_s23 = sshll.u32 %s4375_s22, 4  ;;  %s101_s26 = sshll.u32 %s4376_s24, 4  ;;  %s80_s23 = int_to_ptr.vmem [resolvable:$true] %s79_s23  ;;  %s102_s26 = int_to_ptr.vmem [resolvable:$true] %s101_s26 }
  0x19   :  { %s4234_s29 = scalar_lea.hbm %s5079_s11, 512 }
  0x1a   :  { %p4235_p8 = scmp.ne.s32.totalorder %s5079_s11, %s4234_s29  ;;  %p4238_p9 = scmp.lt.u32.totalorder %s4234_s29, %s5079_s11 }
  0x1c   :  { %p4240_p10 = pnand %p4238_p9, %p4235_p8 }
  0x1e   :  { %4243 = shalt.err (!%p4240_p10)
}
  0x1f   :  { %s4244_s9 = scalar_lea.vmem %s80_s23, 512  ;;  %p4249_p12 = scmp.lt.s32.totalorder %s80_s23, %s80_s23 }
  0x20   :  { %p4245_p11 = scmp.ne.s32.totalorder %s80_s23, %s4244_s9  ;;  %p4250_p13 = scmp.lt.s32.totalorder %s4244_s9, %s4244_s9 }
  0x22   :  { %p4251_p0 = por %p4250_p13, %p4249_p12 }
  0x24   :  { %p4252_p1 = pnand %p4251_p0, %p4245_p11 }
  0x26   :  { %4255 = shalt.err (!%p4252_p1)
}
  0x27   :  { %s4377_s25 = smov 128   ;;  %s4378_s1 = smov 8  }
  0x28   :  { %85 = dma.hbm_to_vmem [thread:$0]  %s5079_s11, 512, %s80_s23, [#allocation8], %s4377_s25, %s4377_s25, %s4378_s1  }
  0x29   :  { %s4256_s27 = scalar_lea.hbm %s5081_s13, 512 }
  0x2a   :  { %p4257_p2 = scmp.ne.s32.totalorder %s5081_s13, %s4256_s27  ;;  %p4260_p3 = scmp.lt.u32.totalorder %s4256_s27, %s5081_s13 }
  0x2c   :  { %p4262_p4 = pnand %p4260_p3, %p4257_p2 }
  0x2e   :  { %4265 = shalt.err (!%p4262_p4)
}
  0x2f   :  { %s4266_s18 = scalar_lea.vmem %s102_s26, 512  ;;  %p4271_p6 = scmp.lt.s32.totalorder %s102_s26, %s102_s26 }
  0x30   :  { %p4267_p5 = scmp.ne.s32.totalorder %s102_s26, %s4266_s18  ;;  %p4272_p7 = scmp.lt.s32.totalorder %s4266_s18, %s4266_s18 }
  0x32   :  { %p4273_p8 = por %p4272_p7, %p4271_p6 }
  0x34   :  { %p4274_p9 = pnand %p4273_p8, %p4267_p5 }
  0x36   :  { %4277 = shalt.err (!%p4274_p9)
}
  0x37   :  { %107 = dma.hbm_to_vmem [thread:$0]  %s5081_s13, 512, %s102_s26, [#allocation11], %s4377_s25, %s4377_s25, %s4378_s1  }
  0x38   :  { %s4379_s19 = smov [#allocation2]   ;;  %s4380_s20 = smov [#allocation6]  }
  0x39   :  { %s34_s9 = sshll.u32 %s4379_s19, 4  ;;  %s67_s21 = sshll.u32 %s4380_s20, 4  ;;  %s35_s9 = int_to_ptr.vmem [resolvable:$true] %s34_s9  ;;  %s68_s21 = int_to_ptr.vmem [resolvable:$true] %s67_s21 }
  0x3a   :  { %s5090_s27 = sld [smem:[#allocation18_spill]] }
  0x40   :  { %s4278_s28 = scalar_lea.hbm %s5090_s27, 128 }
  0x41   :  { %p4279_p10 = scmp.ne.s32.totalorder %s5090_s27, %s4278_s28  ;;  %p4282_p11 = scmp.lt.u32.totalorder %s4278_s28, %s5090_s27 }
  0x43   :  { %p4284_p12 = pnand %p4282_p11, %p4279_p10 }
  0x45   :  { %4287 = shalt.err (!%p4284_p12)
}
  0x46   :  { %s4288_s13 = scalar_lea.vmem %s35_s9, 128  ;;  %p4293_p0 = scmp.lt.s32.totalorder %s35_s9, %s35_s9 }
  0x47   :  { %p4289_p13 = scmp.ne.s32.totalorder %s35_s9, %s4288_s13  ;;  %p4294_p1 = scmp.lt.s32.totalorder %s4288_s13, %s4288_s13 }
  0x49   :  { %p4295_p2 = por %p4294_p1, %p4293_p0 }
  0x4b   :  { %p4296_p3 = pnand %p4295_p2, %p4289_p13 }
  0x4d   :  { %4299 = shalt.err (!%p4296_p3)
}
  0x4e   :  { %37 = dma.hbm_to_vmem [thread:$0]  %s5090_s27, 128, %s35_s9, [#allocation3]  }
  0x4f   :  { %s4300_s20 = scalar_lea.hbm %s5078_s10, 512 }
  0x50   :  { %p4301_p4 = scmp.ne.s32.totalorder %s5078_s10, %s4300_s20  ;;  %p4304_p5 = scmp.lt.u32.totalorder %s4300_s20, %s5078_s10 }
  0x52   :  { %p4306_p6 = pnand %p4304_p5, %p4301_p4 }
  0x54   :  { %4309 = shalt.err (!%p4306_p6)
}
  0x55   :  { %s4310_s0 = scalar_lea.vmem %s68_s21, 512  ;;  %p4315_p8 = scmp.lt.s32.totalorder %s68_s21, %s68_s21 }
  0x56   :  { %p4311_p7 = scmp.ne.s32.totalorder %s68_s21, %s4310_s0  ;;  %p4316_p9 = scmp.lt.s32.totalorder %s4310_s0, %s4310_s0 }
  0x58   :  { %p4317_p10 = por %p4316_p9, %p4315_p8 }
  0x5a   :  { %p4318_p11 = pnand %p4317_p10, %p4311_p7 }
  0x5c   :  { %4321 = shalt.err (!%p4318_p11)
}
  0x5d   :  { %73 = dma.hbm_to_vmem [thread:$0]  %s5078_s10, 512, %s68_s21, [#allocation5], %s4377_s25, %s4377_s25, %s4378_s1  }
  0x5e   :  { %s4381_s30 = smov [#allocation9]   ;;  %s4382_s13 = smov [#allocation12]  }
  0x5f   :  { %s92_s18 = sshll.u32 %s4381_s30, 4  ;;  %s114_s26 = sshll.u32 %s4382_s13, 4  ;;  %s93_s18 = int_to_ptr.vmem [resolvable:$true] %s92_s18  ;;  %s115_s26 = int_to_ptr.vmem [resolvable:$true] %s114_s26 }
  0x60   :  { %s4322_s19 = scalar_lea.hbm %s5080_s12, 16 }
  0x61   :  { %p4323_p12 = scmp.ne.s32.totalorder %s5080_s12, %s4322_s19  ;;  %p4326_p13 = scmp.lt.u32.totalorder %s4322_s19, %s5080_s12 }
  0x63   :  { %p4328_p0 = pnand %p4326_p13, %p4323_p12 }
  0x65   :  { %4331 = shalt.err (!%p4328_p0)
}
  0x66   :  { %s4332_s10 = scalar_lea.vmem %s93_s18, 16  ;;  %s4336_s25 = scalar_lea.vmem %s93_s18, 32 }
  0x67   :  { %p4333_p1 = scmp.ne.s32.totalorder %s93_s18, %s4332_s10  ;;  %p4337_p2 = scmp.lt.s32.totalorder %s93_s18, %s93_s18 }
  0x68   :  { %p4338_p3 = scmp.lt.s32.totalorder %s4336_s25, %s4332_s10 }
  0x6a   :  { %p4339_p4 = por %p4338_p3, %p4337_p2 }
  0x6c   :  { %p4340_p5 = pnand %p4339_p4, %p4333_p1 }
  0x6e   :  { %4343 = shalt.err (!%p4340_p5)
}
  0x6f   :  { %95 = dma.hbm_to_vmem [thread:$0]  %s5080_s12, 16, %s93_s18, [#allocation8]  }
  0x70   :  { %s4344_s9 = scalar_lea.hbm %s5082_s14, 16 }
  0x71   :  { %p4345_p6 = scmp.ne.s32.totalorder %s5082_s14, %s4344_s9  ;;  %p4348_p7 = scmp.lt.u32.totalorder %s4344_s9, %s5082_s14 }
  0x73   :  { %p4350_p8 = pnand %p4348_p7, %p4345_p6 }
  0x75   :  { %4353 = shalt.err (!%p4350_p8)
}
  0x76   :  { %s4354_s23 = scalar_lea.vmem %s115_s26, 16  ;;  %s4358_s19 = scalar_lea.vmem %s115_s26, 32 }
  0x77   :  { %p4355_p9 = scmp.ne.s32.totalorder %s115_s26, %s4354_s23  ;;  %p4359_p10 = scmp.lt.s32.totalorder %s115_s26, %s115_s26 }
  0x78   :  { %p4360_p11 = scmp.lt.s32.totalorder %s4358_s19, %s4354_s23 }
  0x7a   :  { %p4361_p12 = por %p4360_p11, %p4359_p10 }
  0x7c   :  { %p4362_p13 = pnand %p4361_p12, %p4355_p9 }
  0x7e   :  { %4365 = shalt.err (!%p4362_p13)
}
  0x7f   :  { %117 = dma.hbm_to_vmem [thread:$0]  %s5082_s14, 16, %s115_s26, [#allocation11]  }
  0x80   :  { %4366 = dma.done.wait [#allocation3], 128  }
  0x81   :  { %4367 = vsyncadd [#allocation3], 4294967168 }
  0x82   :  { %4368 = dma.done.wait [#allocation5], 528  }
  0x83   :  { %4369 = vsyncadd [#allocation5], 4294966768 }
  0x84   :  { %4370 = dma.done.wait [#allocation8], 528  }
  0x85   :  { %4371 = vsyncadd [#allocation8], 4294966768 }
  0x86   :  { %4372 = dma.done.wait [#allocation11], 528  }
  0x87   :  { %4373 = vsyncadd [#allocation11], 4294966768  ;;  %vm164_vm0 = vcmask 1045504   ;;  %vm157_vm1 = vcmask 48128   ;;  %v149_v0 = vld [vmem:[#allocation2] sm:$0x3f] }
  0x88   :  { %s5091_s24 = sld [smem:[#allocation17_spill]]  ;;  %3487 = vmatprep.subr.msk.mxu0 %vm164_vm0, %v149_v0  ;;  %v3270_v3 = vld [vmem:[%s5071_s3] ss:$0 sm:$0xff]  ;;  %s4383_s25 = smov 32   ;;  %v146_v16 = vld [vmem:[%s5070_s2 + $0x8] sm:$0xff]  ;;  %v147_v17 = vld [vmem:[%s5070_s2 + $0x10] sm:$0xff] }
  0x89   :  { %3488 = vmatpush3.msk.msra.mxu0 %vm164_vm0, %v149_v0  ;;  %v145_v15 = vld [vmem:[%s5070_s2] sm:$0xff]  ;;  %v4384_v18 = vmov 0.0|0.0   ;;  %v148_v20 = vld [vmem:[%s5070_s2 + $0x18] sm:$0xff]  ;;  %vm4385_vm2 = vmmov 0   ;;  %v4386_v21 = vmov 0.0   ;;  %s4387_s2 = smov 64  }
  0x8a   :  { %3800 = vmatprep.subr.bf16.mxu1 %v4384_v18  ;;  %v4599_v19 = vpack.c.bf16 %v146_v16, %v145_v15  ;;  %3500 = vmatprep.mubr.msk.f32.mxu1 %vm4385_vm2, %v4386_v21  ;;  %v4610_v22 = vpack.c.bf16 %v148_v20, %v147_v17  ;;  %vm264_vm3 = vcmask 261120   ;;  %vm1008_vm4 = vcmask 1041408  }
  0x8b   :  { %3806 = vmatprep.subr.bf16.mxu0 %v4384_v18  ;;  %vm1010_vm5 = vcmask 1043456  }
  0x8c   :  { %3802 = vmatpush3.bf16.msra.mxu1 %v4599_v19 }
  0x8d   :  { %3803 = vmatprep.subr.bf16.mxu1 %v4384_v18 }
  0x8e   :  { %v143_v1 = vld [vmem:[%s5091_s24] sm:$0xff]  ;;  %v144_v2 = vld [vmem:[%s5091_s24 + $0x8] sm:$0xff] }
  0x8f   :  { %3489 = vmatprep.mubr.msk.f32.mxu0 %vm157_vm1, %v143_v1 }
  0x90   :  { %3490 = vmatmul.mubr.msk.f32.vlgmr.msra.gmra.mrb[0].mxu0 %vm157_vm1, %v144_v2  ;;  %3805 = vmatpush3.bf16.msra.mxu1 %v4610_v22 }
  0x91   :  { %3511 = vmatprep.mubr.msk.f32.mxu0 %vm4385_vm2, %v4386_v21  ;;  %3808 = vmatpush3.bf16.msra.mxu0 %v4599_v19 }
  0x92   :  { %3809 = vmatprep.subr.bf16.mxu0 %v4384_v18  ;;  %3812 = vmatprep.subr.bf16.mxu1 %v4384_v18 }
  0x95   :  { %3811 = vmatpush3.bf16.msra.mxu0 %v4610_v22 }
  0x96   :  { %3818 = vmatprep.subr.bf16.mxu0 %v4384_v18 }
 0x163   :  { %v3491_v4 = vpop.f32.mrb[0].mxu0 }
 0x164   :  { %v4582_v5 = vadd.f32 %v3491_v4, %v3270_v3  ;;  %v234_v6 = vpop.f32.mrb[1].mxu0 }
 0x165   :  { %v4584_v7 = vadd.f32 %v3270_v3, %v234_v6 }
 0x167   :  { %3992 = vtanh.f32 %v4584_v7  ;;  %v3274_v9 = vmul.f32 -1.442695, %v4584_v7 }
 0x169   :  { %3994 = vpow2.f32 %v3274_v9 }
 0x171   :  { %v3993_v8 = vpop.eup %3992 }
 0x172   :  { %251 = vrot.lane.b32.xlu0 %v3993_v8, %s4383_s25 }
 0x173   :  { %v3995_v10 = vpop.eup %3994 }
 0x174   :  { %v246_v11 = vadd.f32 1.0, %v3995_v10 }
 0x176   :  { %3996 = vrcp.f32 %v246_v11 }
 0x180   :  { %v3997_v12 = vpop.eup %3996 }
 0x1e4   :  { %v252_v13 = vpop.permute.xlu0 %251 }
 0x1e5   :  { %v254_v14 = vmul.f32 %v3997_v12, %v252_v13 }
 0x1e7   :  { %3998 = vtanh.f32 %v254_v14  ;;  %v349_v24 = vrot.slane %v254_v14, 6 }
 0x1f1   :  { %v3999_v23 = vpop.eup %3998 }
 0x1f2   :  { %257 = vrot.lane.b32.xlu0 %v3999_v23, %s4387_s2 }
 0x1f6   :  { %350 = vrot.lane.b32.xlu0 %v349_v24, %s4383_s25 }
 0x264   :  { %v258_v25 = vpop.permute.xlu0 %257 }
 0x265   :  { %v4621_v26 = vmul.f32 %v3997_v12, %v258_v25 }
 0x267   :  { %262 = vrot.lane.b32.xlu1 %v4621_v26, %s4387_s2 }
 0x268   :  { %v351_v39 = vpop.permute.xlu0 %350 }
 0x2d9   :  { %v263_v27 = vpop.permute.xlu1 %262 }
 0x2da   :  { %3501 = vmatmul.mubr.msk.f32.vlgmr.msra.gmra.mrb[0].mxu1 %vm264_vm3, %v263_v27 }
 0x2db   :  { %3814 = vmatpush3.bf16.msra.mxu1 %v4599_v19  ;;  %3522 = vmatprep.mubr.msk.f32.mxu1 %vm4385_vm2, %v4386_v21 }
 0x2dc   :  { %3815 = vmatprep.subr.bf16.mxu1 %v4384_v18 }
 0x2df   :  { %3817 = vmatpush3.bf16.msra.mxu1 %v4610_v22 }
 0x2e0   :  { %3824 = vmatprep.subr.bf16.mxu1 %v4384_v18 }
 0x3ad   :  { %v333_v28 = vpop.f32.mrb[0].mxu1 }
 0x3ae   :  { %v338_v29 = vrot.slane %v333_v28, 6  ;;  %v3502_v30 = vpop.f32.mrb[1].mxu1 }
 0x3b0   :  { %v340_v31 = vadd.f32 %v338_v29, %v4584_v7 }
 0x3b2   :  { %4000 = vtanh.f32 %v340_v31  ;;  %v3276_v33 = vmul.f32 -1.442695, %v340_v31 }
 0x3b4   :  { %4002 = vpow2.f32 %v3276_v33 }
 0x3bc   :  { %v4001_v32 = vpop.eup %4000 }
 0x3bd   :  { %355 = vrot.lane.b32.xlu1 %v4001_v32, %s4383_s25 }
 0x3be   :  { %v4003_v34 = vpop.eup %4002 }
 0x3bf   :  { %v344_v35 = vadd.f32 1.0, %v4003_v34 }
 0x3c1   :  { %4004 = vrcp.f32 %v344_v35 }
 0x3cb   :  { %v4005_v36 = vpop.eup %4004 }
 0x3cc   :  { %v353_v40 = vmul.f32 %v4005_v36, %v351_v39 }
 0x42f   :  { %v356_v37 = vpop.permute.xlu1 %355 }
 0x430   :  { %v358_v38 = vmul.f32 %v4005_v36, %v356_v37 }
 0x432   :  { %360 = vrot.lane.b32.xlu1 %v358_v38, %s4383_s25 }
 0x4a4   :  { %v361_v41 = vpop.permute.xlu1 %360 }
 0x4a5   :  { %v363_v42 = vadd.f32 %v361_v41, %v353_v40 }
 0x4a7   :  { %4006 = vtanh.f32 %v363_v42  ;;  %v458_v59 = vrot.slane %v363_v42, 6 }
 0x4b1   :  { %v4007_v43 = vpop.eup %4006 }
 0x4b2   :  { %366 = vrot.lane.b32.xlu0 %v4007_v43, %s4383_s25 }
 0x524   :  { %v367_v44 = vpop.permute.xlu0 %366 }
 0x525   :  { %v369_v45 = vmul.f32 %v4005_v36, %v367_v44 }
 0x527   :  { %v371_v46 = vrot.slane %v369_v45, 2  ;;  %v1009_v2 = vsel %vm1008_vm4, %v4621_v26, %v369_v45 }
 0x529   :  { %372 = vrot.lane.b32.xlu1 %v371_v46, %s4387_s2 }
 0x59b   :  { %v373_v47 = vpop.permute.xlu1 %372 }
 0x59c   :  { %3512 = vmatmul.mubr.msk.f32.vlgmr.msra.gmra.mrb[2].mxu0 %vm264_vm3, %v373_v47 }
 0x59d   :  { %3820 = vmatpush3.bf16.msra.mxu0 %v4599_v19  ;;  %3533 = vmatprep.mubr.msk.f32.mxu0 %vm4385_vm2, %v4386_v21 }
 0x59e   :  { %3821 = vmatprep.subr.bf16.mxu0 %v4384_v18 }
 0x5a1   :  { %3823 = vmatpush3.bf16.msra.mxu0 %v4610_v22 }
 0x5a2   :  { %3830 = vmatprep.subr.bf16.mxu0 %v4384_v18 }
 0x66f   :  { %v442_v48 = vpop.f32.mrb[2].mxu0 }
 0x670   :  { %v447_v49 = vrot.slane %v442_v48, 4  ;;  %v3513_v50 = vpop.f32.mrb[3].mxu0 }
 0x672   :  { %v449_v51 = vadd.f32 %v447_v49, %v4584_v7 }
 0x674   :  { %4008 = vtanh.f32 %v449_v51  ;;  %v3278_v53 = vmul.f32 -1.442695, %v449_v51 }
 0x676   :  { %4010 = vpow2.f32 %v3278_v53 }
 0x67e   :  { %v4009_v52 = vpop.eup %4008 }
 0x67f   :  { %462 = vrot.lane.b32.xlu0 %v4009_v52, %s4383_s25 }
 0x680   :  { %v4011_v54 = vpop.eup %4010 }
 0x681   :  { %v453_v55 = vadd.f32 1.0, %v4011_v54 }
 0x683   :  { %4012 = vrcp.f32 %v453_v55 }
 0x68d   :  { %v4013_v56 = vpop.eup %4012 }
 0x68e   :  { %v460_v60 = vmul.f32 %v4013_v56, %v458_v59 }
 0x6f1   :  { %v463_v57 = vpop.permute.xlu0 %462 }
 0x6f2   :  { %v465_v58 = vmul.f32 %v4013_v56, %v463_v57 }
 0x6f4   :  { %467 = vrot.lane.b32.xlu1 %v465_v58, %s4383_s25 }
 0x766   :  { %v468_v61 = vpop.permute.xlu1 %467 }
 0x767   :  { %v470_v62 = vadd.f32 %v468_v61, %v460_v60 }
 0x769   :  { %4014 = vtanh.f32 %v470_v62  ;;  %v565_v23 = vrot.slane %v470_v62, 6 }
 0x773   :  { %v4015_v63 = vpop.eup %4014 }
 0x774   :  { %473 = vrot.lane.b32.xlu0 %v4015_v63, %s4383_s25 }
 0x7e6   :  { %v474_v0 = vpop.permute.xlu0 %473 }
 0x7e7   :  { %v476_v1 = vmul.f32 %v4013_v56, %v474_v0 }
 0x7e9   :  { %v478_v3 = vrot.slane %v476_v1, 4  ;;  %v1011_v4 = vsel %vm1010_vm5, %v1009_v2, %v476_v1 }
 0x7eb   :  { %479 = vrot.lane.b32.xlu1 %v478_v3, %s4387_s2 }
 0x85d   :  { %v480_v6 = vpop.permute.xlu1 %479 }
 0x85e   :  { %3523 = vmatmul.mubr.msk.f32.vlgmr.msra.gmra.mrb[2].mxu1 %vm264_vm3, %v480_v6 }
 0x85f   :  { %3826 = vmatpush3.bf16.msra.mxu1 %v4599_v19  ;;  %3544 = vmatprep.mubr.msk.f32.mxu1 %vm4385_vm2, %v4386_v21 }
 0x860   :  { %3827 = vmatprep.subr.bf16.mxu1 %v4384_v18 }
 0x863   :  { %3829 = vmatpush3.bf16.msra.mxu1 %v4610_v22 }
 0x864   :  { %3836 = vmatprep.subr.bf16.mxu1 %v4384_v18 }
 0x931   :  { %v549_v8 = vpop.f32.mrb[2].mxu1 }
 0x932   :  { %v554_v9 = vrot.slane %v549_v8, 2  ;;  %v3524_v10 = vpop.f32.mrb[3].mxu1 }
 0x934   :  { %v556_v11 = vadd.f32 %v554_v9, %v4584_v7 }
 0x936   :  { %4016 = vtanh.f32 %v556_v11  ;;  %v3280_v13 = vmul.f32 -1.442695, %v556_v11 }
 0x938   :  { %4018 = vpow2.f32 %v3280_v13 }
 0x940   :  { %v4017_v12 = vpop.eup %4016 }
 0x941   :  { %569 = vrot.lane.b32.xlu0 %v4017_v12, %s4383_s25 }
 0x942   :  { %v4019_v14 = vpop.eup %4018 }
 0x943   :  { %v560_v15 = vadd.f32 1.0, %v4019_v14 }
 0x945   :  { %4020 = vrcp.f32 %v560_v15 }
 0x94f   :  { %v4021_v16 = vpop.eup %4020 }
 0x950   :  { %v567_v24 = vmul.f32 %v4021_v16, %v565_v23 }
 0x9b3   :  { %v570_v17 = vpop.permute.xlu0 %569 }
 0x9b4   :  { %v572_v20 = vmul.f32 %v4021_v16, %v570_v17 }
 0x9b6   :  { %574 = vrot.lane.b32.xlu1 %v572_v20, %s4383_s25 }
 0xa28   :  { %v575_v25 = vpop.permute.xlu1 %574 }
 0xa29   :  { %v577_v26 = vadd.f32 %v575_v25, %v567_v24 }
 0xa2b   :  { %4022 = vtanh.f32 %v577_v26  ;;  %v669_v42 = vrot.slane %v577_v26, 6 }
 0xa35   :  { %v4023_v7 = vpop.eup %4022 }
 0xa36   :  { %580 = vrot.lane.b32.xlu0 %v4023_v7, %s4383_s25 }
 0xaa8   :  { %v581_v27 = vpop.permute.xlu0 %580 }
 0xaa9   :  { %v583_v28 = vmul.f32 %v4021_v16, %v581_v27 }
 0xaab   :  { %v585_v29 = vrot.slane %v583_v28, 6  ;;  %v4664_v30 = vsel %vm164_vm0, %v1011_v4, %v583_v28 }
 0xaad   :  { %586 = vrot.lane.b32.xlu1 %v585_v29, %s4387_s2 }
 0xb1f   :  { %v587_v31 = vpop.permute.xlu1 %586 }
 0xb20   :  { %3534 = vmatmul.mubr.msk.f32.vlgmr.msra.gmra.mrb[4].mxu0 %vm264_vm3, %v587_v31 }
 0xb21   :  { %3832 = vmatpush3.bf16.msra.mxu0 %v4599_v19  ;;  %3555 = vmatprep.mubr.msk.f32.mxu0 %vm4385_vm2, %v4386_v21 }
 0xb22   :  { %3833 = vmatprep.subr.bf16.mxu0 %v4384_v18 }
 0xb25   :  { %3835 = vmatpush3.bf16.msra.mxu0 %v4610_v22 }
 0xbf3   :  { %v656_v32 = vpop.f32.mrb[4].mxu0 }
 0xbf4   :  { %v660_v33 = vadd.f32 %v656_v32, %v4582_v5  ;;  %v3535_v34 = vpop.f32.mrb[5].mxu0 }
 0xbf6   :  { %4024 = vtanh.f32 %v660_v33  ;;  %v3282_v36 = vmul.f32 -1.442695, %v660_v33 }
 0xbf8   :  { %4026 = vpow2.f32 %v3282_v36 }
 0xc00   :  { %v4025_v35 = vpop.eup %4024 }
 0xc01   :  { %673 = vrot.lane.b32.xlu0 %v4025_v35, %s4383_s25 }
 0xc02   :  { %v4027_v37 = vpop.eup %4026 }
 0xc03   :  { %v664_v38 = vadd.f32 1.0, %v4027_v37 }
 0xc05   :  { %4028 = vrcp.f32 %v664_v38 }
 0xc0f   :  { %v4029_v39 = vpop.eup %4028 }
 0xc10   :  { %v671_v43 = vmul.f32 %v4029_v39, %v669_v42 }
 0xc73   :  { %v674_v40 = vpop.permute.xlu0 %673 }
 0xc74   :  { %v676_v41 = vmul.f32 %v4029_v39, %v674_v40 }
 0xc76   :  { %678 = vrot.lane.b32.xlu1 %v676_v41, %s4383_s25 }
 0xce8   :  { %v679_v44 = vpop.permute.xlu1 %678 }
 0xce9   :  { %v681_v45 = vadd.f32 %v679_v44, %v671_v43 }
 0xceb   :  { %4030 = vtanh.f32 %v681_v45 }
 0xcf5   :  { %v4031_v46 = vpop.eup %4030 }
 0xcf6   :  { %684 = vrot.lane.b32.xlu0 %v4031_v46, %s4383_s25 }
 0xd68   :  { %v685_v47 = vpop.permute.xlu0 %684 }
 0xd69   :  { %v4677_v48 = vmul.f32 %v4029_v39, %v685_v47  ;;  %v1020_v47 = vld [vmem:[%s5072_s4] sm:$0xff] }
 0xd6b   :  { %689 = vrot.lane.b32.xlu1 %v4677_v48, %s4387_s2 }
 0xddd   :  { %v690_v49 = vpop.permute.xlu1 %689 }
 0xdde   :  { %3545 = vmatmul.mubr.msk.f32.vlgmr.msra.gmra.mrb[4].mxu1 %vm264_vm3, %v690_v49  ;;  %v1022_v49 = vld [vmem:[%s5072_s4 + $0x10] sm:$0xff] }
 0xddf   :  { %3838 = vmatpush3.bf16.msra.mxu1 %v4599_v19  ;;  %3566 = vmatprep.mubr.msk.f32.mxu1 %vm4385_vm2, %v4386_v21 }
 0xde0   :  { %3839 = vmatprep.subr.bf16.mxu1 %v4384_v18 }
 0xde3   :  { %3841 = vmatpush3.bf16.msra.mxu1 %v4610_v22  ;;  %v775_v22 = vrot.slane %v681_v45, 6 }
 0xde4   :  { %3850 = vmatprep.subr.bf16.mxu1 %v4384_v18 }
 0xeb1   :  { %v759_v50 = vpop.f32.mrb[4].mxu1 }
 0xeb2   :  { %v764_v51 = vrot.slane %v759_v50, 6  ;;  %v3546_v52 = vpop.f32.mrb[5].mxu1  ;;  %v1023_v50 = vld [vmem:[%s5072_s4 + $0x18] sm:$0xff] }
 0xeb4   :  { %v766_v53 = vadd.f32 %v764_v51, %v4582_v5  ;;  %v3846_v51 = vpack.c.bf16 %v1023_v50, %v1022_v49 }
 0xeb6   :  { %4032 = vtanh.f32 %v766_v53  ;;  %v3284_v55 = vmul.f32 -1.442695, %v766_v53 }
 0xeb8   :  { %4034 = vpow2.f32 %v3284_v55 }
 0xec0   :  { %v4033_v54 = vpop.eup %4032 }
 0xec1   :  { %779 = vrot.lane.b32.xlu0 %v4033_v54, %s4383_s25 }
 0xec2   :  { %v4035_v19 = vpop.eup %4034 }
 0xec3   :  { %v770_v56 = vadd.f32 1.0, %v4035_v19 }
 0xec5   :  { %4036 = vrcp.f32 %v770_v56  ;;  %v3289_v56 = vld [vmem:[%s5074_s6] ss:$0 sm:$0xff] }
 0xecf   :  { %v4037_v57 = vpop.eup %4036 }
 0xed0   :  { %v777_v60 = vmul.f32 %v4037_v57, %v775_v22 }
 0xf33   :  { %v780_v58 = vpop.permute.xlu0 %779 }
 0xf34   :  { %v782_v59 = vmul.f32 %v4037_v57, %v780_v58 }
 0xf36   :  { %784 = vrot.lane.b32.xlu1 %v782_v59, %s4383_s25 }
 0xfa8   :  { %v785_v61 = vpop.permute.xlu1 %784 }
 0xfa9   :  { %v787_v62 = vadd.f32 %v785_v61, %v777_v60 }
 0xfab   :  { %4038 = vtanh.f32 %v787_v62  ;;  %v882_v17 = vrot.slane %v787_v62, 6 }
 0xfb5   :  { %v4039_v63 = vpop.eup %4038 }
 0xfb6   :  { %790 = vrot.lane.b32.xlu0 %v4039_v63, %s4383_s25 }
0x1028   :  { %v791_v0 = vpop.permute.xlu0 %790 }
0x1029   :  { %v793_v1 = vmul.f32 %v4037_v57, %v791_v0 }
0x102b   :  { %v795_v2 = vrot.slane %v793_v1, 2  ;;  %v1013_v27 = vsel %vm1008_vm4, %v4677_v48, %v793_v1  ;;  %v1021_v48 = vld [vmem:[%s5072_s4 + $0x8] sm:$0xff] }
0x102d   :  { %796 = vrot.lane.b32.xlu1 %v795_v2, %s4387_s2 }
0x109f   :  { %v797_v3 = vpop.permute.xlu1 %796 }
0x10a0   :  { %3556 = vmatmul.mubr.msk.f32.vlgmr.msra.gmra.mrb[6].mxu0 %vm264_vm3, %v797_v3  ;;  %v1016_v3 = vld [vmem:[%s5073_s5] sm:$0xff] }
0x1173   :  { %v866_v4 = vpop.f32.mrb[6].mxu0 }
0x1174   :  { %v871_v6 = vrot.slane %v866_v4, 4  ;;  %v3557_v8 = vpop.f32.mrb[7].mxu0  ;;  %v1017_v4 = vld [vmem:[%s5073_s5 + $0x8] sm:$0xff] }
0x1175   :  { %v4745_v8 = vpack.c.bf16 %v1017_v4, %v1016_v3 }
0x1176   :  { %v873_v9 = vadd.f32 %v871_v6, %v4582_v5  ;;  %v1018_v6 = vld [vmem:[%s5073_s5 + $0x10] sm:$0xff] }
0x1178   :  { %4040 = vtanh.f32 %v873_v9  ;;  %v3286_v11 = vmul.f32 -1.442695, %v873_v9  ;;  %v1019_v9 = vld [vmem:[%s5073_s5 + $0x18] sm:$0xff] }
0x117a   :  { %4042 = vpow2.f32 %v3286_v11 }
0x1182   :  { %v4041_v10 = vpop.eup %4040 }
0x1183   :  { %886 = vrot.lane.b32.xlu0 %v4041_v10, %s4383_s25  ;;  %v4752_v10 = vpack.c.bf16 %v1019_v9, %v1018_v6 }
0x1184   :  { %v4043_v12 = vpop.eup %4042 }
0x1185   :  { %v877_v13 = vadd.f32 1.0, %v4043_v12 }
0x1187   :  { %4044 = vrcp.f32 %v877_v13 }
0x1191   :  { %v4045_v14 = vpop.eup %4044 }
0x1192   :  { %v884_v20 = vmul.f32 %v4045_v14, %v882_v17 }
0x11f5   :  { %v887_v15 = vpop.permute.xlu0 %886 }
0x11f6   :  { %v889_v16 = vmul.f32 %v4045_v14, %v887_v15 }
0x11f8   :  { %891 = vrot.lane.b32.xlu1 %v889_v16, %s4383_s25 }
0x126a   :  { %v892_v23 = vpop.permute.xlu1 %891 }
0x126b   :  { %v894_v24 = vadd.f32 %v892_v23, %v884_v20 }
0x126d   :  { %4046 = vtanh.f32 %v894_v24  ;;  %v989_v43 = vrot.slane %v894_v24, 6 }
0x1277   :  { %v4047_v25 = vpop.eup %4046 }
0x1278   :  { %897 = vrot.lane.b32.xlu0 %v4047_v25, %s4383_s25 }
0x12ea   :  { %v898_v26 = vpop.permute.xlu0 %897 }
0x12eb   :  { %v900_v7 = vmul.f32 %v4045_v14, %v898_v26 }
0x12ed   :  { %v902_v28 = vrot.slane %v900_v7, 4  ;;  %v1014_v29 = vsel %vm1010_vm5, %v1013_v27, %v900_v7 }
0x12ef   :  { %903 = vrot.lane.b32.xlu1 %v902_v28, %s4387_s2 }
0x1361   :  { %v904_v31 = vpop.permute.xlu1 %903 }
0x1362   :  { %3567 = vmatmul.mubr.msk.f32.vlgmr.msra.gmra.mrb[6].mxu1 %vm264_vm3, %v904_v31 }
0x1363   :  { %3588 = vmatprep.mubr.msk.f32.mxu1 %vm4385_vm2, %v4386_v21  ;;  %3852 = vmatpush3.bf16.msra.mxu1 %v4745_v8 }
0x1364   :  { %3853 = vmatprep.subr.bf16.mxu1 %v4384_v18 }
0x1367   :  { %3855 = vmatpush3.bf16.msra.mxu1 %v4752_v10 }
0x1368   :  { %3862 = vmatprep.subr.bf16.mxu1 %v4384_v18 }
0x1435   :  { %v973_v32 = vpop.f32.mrb[6].mxu1 }
0x1436   :  { %v978_v33 = vrot.slane %v973_v32, 2  ;;  %v3568_v34 = vpop.f32.mrb[7].mxu1 }
0x1438   :  { %v980_v35 = vadd.f32 %v978_v33, %v4582_v5 }
0x143a   :  { %4048 = vtanh.f32 %v980_v35  ;;  %v3288_v37 = vmul.f32 -1.442695, %v980_v35 }
0x143c   :  { %4050 = vpow2.f32 %v3288_v37 }
0x1444   :  { %v4049_v36 = vpop.eup %4048 }
0x1445   :  { %993 = vrot.lane.b32.xlu0 %v4049_v36, %s4383_s25 }
0x1446   :  { %v4051_v38 = vpop.eup %4050 }
0x1447   :  { %v984_v39 = vadd.f32 1.0, %v4051_v38 }
0x1449   :  { %4052 = vrcp.f32 %v984_v39 }
0x1453   :  { %v4053_v40 = vpop.eup %4052 }
0x1454   :  { %v991_v44 = vmul.f32 %v4053_v40, %v989_v43 }
0x14b7   :  { %v994_v41 = vpop.permute.xlu0 %993 }
0x14b8   :  { %v996_v42 = vmul.f32 %v4053_v40, %v994_v41 }
0x14ba   :  { %998 = vrot.lane.b32.xlu1 %v996_v42, %s4383_s25 }
0x14be   :  { %1033 = vrot.lane.b32.xlu1 %v4664_v30, %s4387_s2  ;;  %v3842_v30 = vpack.c.bf16 %v1021_v48, %v1020_v47 }
0x14c0   :  { %3843 = vmatprep.subr.bf16.mxu0 %v3842_v30 }
0x14c1   :  { %3845 = vmatpush3.bf16.msra.mxu0 %v3842_v30 }
0x14c2   :  { %3847 = vmatprep.subr.bf16.mxu0 %v3846_v51 }
0x14c5   :  { %3849 = vmatpush3.bf16.msra.mxu0 %v3846_v51 }
0x14c6   :  { %3856 = vmatprep.subr.bf16.mxu0 %v4384_v18 }
0x152c   :  { %v999_v5 = vpop.permute.xlu1 %998 }
0x152d   :  { %v1001_v45 = vadd.f32 %v999_v5, %v991_v44 }
0x152f   :  { %4054 = vtanh.f32 %v1001_v45 }
0x1530   :  { %v1034_v46 = vpop.permute.xlu1 %1033 }
0x1531   :  { %3577 = vmatprep.mubr.msk.f32.mxu0 %vm264_vm3, %v1034_v46 }
0x1539   :  { %v4055_v52 = vpop.eup %4054 }
0x153a   :  { %1004 = vrot.lane.b32.xlu0 %v4055_v52, %s4383_s25 }
0x15ac   :  { %v1005_v53 = vpop.permute.xlu0 %1004 }
0x15ad   :  { %v1007_v54 = vmul.f32 %v4053_v40, %v1005_v53 }
0x15af   :  { %v1015_v55 = vsel %vm164_vm0, %v1014_v29, %v1007_v54 }
0x15b0   :  { %1035 = vrot.lane.b32.xlu0 %v1015_v55, %s4387_s2 }
0x1622   :  { %v1036_v19 = vpop.permute.xlu0 %1035 }
0x1623   :  { %3578 = vmatmul.mubr.msk.f32.vlgmr.msra.gmra.mrb[8].mxu0 %vm264_vm3, %v1036_v19 }
0x1624   :  { %3599 = vmatprep.mubr.msk.f32.mxu0 %vm4385_vm2, %v4386_v21  ;;  %3858 = vmatpush3.bf16.msra.mxu0 %v4745_v8 }
0x1625   :  { %3859 = vmatprep.subr.bf16.mxu0 %v4384_v18 }
0x1628   :  { %3861 = vmatpush3.bf16.msra.mxu0 %v4752_v10 }
0x1629   :  { %3868 = vmatprep.subr.bf16.mxu0 %v4384_v18 }
0x16f6   :  { %v3579_v57 = vpop.f32.mrb[8].mxu0 }
0x16f7   :  { %v4733_v58 = vadd.f32 %v3579_v57, %v3289_v56  ;;  %v1107_v59 = vpop.f32.mrb[9].mxu0 }
0x16f8   :  { %v1108_v22 = vadd.f32 %v3289_v56, %v1107_v59 }
0x16fa   :  { %4056 = vtanh.f32 %v1108_v22  ;;  %v3292_v61 = vmul.f32 -1.442695, %v1108_v22 }
0x16fc   :  { %4058 = vpow2.f32 %v3292_v61 }
0x1704   :  { %v4057_v60 = vpop.eup %4056 }
0x1705   :  { %1124 = vrot.lane.b32.xlu1 %v4057_v60, %s4383_s25 }
0x1706   :  { %v4059_v62 = vpop.eup %4058 }
0x1707   :  { %v1119_v63 = vadd.f32 1.0, %v4059_v62 }
0x1709   :  { %4060 = vrcp.f32 %v1119_v63 }
0x1713   :  { %v4061_v0 = vpop.eup %4060 }
0x1777   :  { %v1125_v1 = vpop.permute.xlu1 %1124 }
0x1778   :  { %v1127_v2 = vmul.f32 %v4061_v0, %v1125_v1 }
0x177a   :  { %4062 = vtanh.f32 %v1127_v2  ;;  %v1221_v31 = vrot.slane %v1127_v2, 4 }
0x1784   :  { %v4063_v11 = vpop.eup %4062 }
0x1785   :  { %1130 = vrot.lane.b32.xlu0 %v4063_v11, %s4387_s2 }
0x17f7   :  { %v1131_v12 = vpop.permute.xlu0 %1130 }
0x17f8   :  { %v4761_v13 = vmul.f32 %v4061_v0, %v1131_v12 }
0x17fa   :  { %1135 = vrot.lane.b32.xlu0 %v4761_v13, %s4387_s2  ;;  %v1242_v14 = vrot.slane %v4761_v13, 2 }
0x17fc   :  { %1243 = vrot.lane.b32.xlu1 %v1242_v14, %s4387_s2 }
0x186c   :  { %v1136_v15 = vpop.permute.xlu0 %1135 }
0x186d   :  { %3589 = vmatmul.mubr.msk.f32.vlgmr.msra.gmra.mrb[8].mxu1 %vm264_vm3, %v1136_v15 }
0x186e   :  { %v1244_v16 = vpop.permute.xlu1 %1243  ;;  %3864 = vmatpush3.bf16.msra.mxu1 %v4745_v8  ;;  %3610 = vmatprep.mubr.msk.f32.mxu1 %vm4385_vm2, %v4386_v21 }
0x186f   :  { %3600 = vmatmul.mubr.msk.f32.vlgmr.msra.gmra.mrb[10].mxu0 %vm264_vm3, %v1244_v16  ;;  %3865 = vmatprep.subr.bf16.mxu1 %v4384_v18 }
0x1870   :  { %3870 = vmatpush3.bf16.msra.mxu0 %v4745_v8  ;;  %3621 = vmatprep.mubr.msk.f32.mxu0 %vm4385_vm2, %v4386_v21 }
0x1871   :  { %3871 = vmatprep.subr.bf16.mxu0 %v4384_v18 }
0x1872   :  { %3867 = vmatpush3.bf16.msra.mxu1 %v4752_v10 }
0x1873   :  { %3874 = vmatprep.subr.bf16.mxu1 %v4384_v18 }
0x1874   :  { %3873 = vmatpush3.bf16.msra.mxu0 %v4752_v10 }
0x1875   :  { %3880 = vmatprep.subr.bf16.mxu0 %v4384_v18 }
0x1940   :  { %v1205_v17 = vpop.f32.mrb[8].mxu1 }
0x1941   :  { %v1210_v20 = vrot.slane %v1205_v17, 4  ;;  %v3590_v23 = vpop.f32.mrb[9].mxu1 }
0x1942   :  { %v1313_v24 = vpop.f32.mrb[10].mxu0 }
0x1943   :  { %v1212_v25 = vadd.f32 %v1210_v20, %v1108_v22  ;;  %v1318_v26 = vrot.slane %v1313_v24, 2  ;;  %v3601_v7 = vpop.f32.mrb[11].mxu0 }
0x1945   :  { %4064 = vtanh.f32 %v1212_v25  ;;  %v1320_v27 = vadd.f32 %v1318_v26, %v1108_v22  ;;  %v3294_v32 = vmul.f32 -1.442695, %v1212_v25 }
0x1947   :  { %4066 = vtanh.f32 %v1320_v27  ;;  %v3296_v33 = vmul.f32 -1.442695, %v1320_v27 }
0x1948   :  { %4068 = vpow2.f32 %v3294_v32 }
0x1949   :  { %4070 = vpow2.f32 %v3296_v33 }
0x194f   :  { %v4065_v28 = vpop.eup %4064 }
0x1950   :  { %1227 = vrot.lane.b32.xlu0 %v4065_v28, %s4383_s25 }
0x1951   :  { %v4067_v29 = vpop.eup %4066 }
0x1952   :  { %1330 = vrot.lane.b32.xlu1 %v4067_v29, %s4383_s25  ;;  %v4069_v34 = vpop.eup %4068 }
0x1953   :  { %v4071_v35 = vpop.eup %4070  ;;  %v1216_v36 = vadd.f32 1.0, %v4069_v34 }
0x1954   :  { %v1324_v37 = vadd.f32 1.0, %v4071_v35 }
0x1955   :  { %4072 = vrcp.f32 %v1216_v36 }
0x1956   :  { %1222 = vrot.lane.b32.xlu1 %v1221_v31, %s4383_s25  ;;  %4074 = vrcp.f32 %v1324_v37 }
0x195f   :  { %v4073_v38 = vpop.eup %4072 }
0x1960   :  { %v4075_v41 = vpop.eup %4074 }
0x19c2   :  { %v1228_v39 = vpop.permute.xlu0 %1227 }
0x19c3   :  { %v1230_v40 = vmul.f32 %v4073_v38, %v1228_v39 }
0x19c4   :  { %v1331_v42 = vpop.permute.xlu1 %1330 }
0x19c5   :  { %1232 = vrot.lane.b32.xlu1 %v1230_v40, %s4383_s25  ;;  %v1333_v43 = vmul.f32 %v4075_v41, %v1331_v42 }
0x19c7   :  { %1335 = vrot.lane.b32.xlu0 %v1333_v43, %s4383_s25 }
0x19c8   :  { %v1223_v44 = vpop.permute.xlu1 %1222 }
0x19c9   :  { %v1225_v5 = vmul.f32 %v4073_v38, %v1223_v44  ;;  %v1328_v47 = vmul.f32 %v4075_v41, %v1223_v44 }
0x1a37   :  { %v1233_v45 = vpop.permute.xlu1 %1232 }
0x1a38   :  { %v4786_v46 = vadd.f32 %v1233_v45, %v1225_v5 }
0x1a39   :  { %v1336_v48 = vpop.permute.xlu0 %1335 }
0x1a3a   :  { %4076 = vtanh.f32 %v4786_v46  ;;  %v4789_v49 = vadd.f32 %v1336_v48, %v1328_v47  ;;  %v1430_v23 = vrot.slane %v4786_v46, 4 }
0x1a3c   :  { %4078 = vtanh.f32 %v4789_v49  ;;  %v1537_v7 = vrot.slane %v4789_v49, 4 }
0x1a44   :  { %v4077_v30 = vpop.eup %4076 }
0x1a45   :  { %1238 = vrot.lane.b32.xlu1 %v4077_v30, %s4383_s25 }
0x1a46   :  { %v4079_v50 = vpop.eup %4078 }
0x1a47   :  { %1341 = vrot.lane.b32.xlu0 %v4079_v50, %s4383_s25 }
0x1ab7   :  { %v1239_v51 = vpop.permute.xlu1 %1238 }
0x1ab8   :  { %v1241_v52 = vmul.f32 %v4073_v38, %v1239_v51 }
0x1ab9   :  { %v1342_v54 = vpop.permute.xlu0 %1341 }
0x1aba   :  { %v1346_v53 = vrot.slane %v1241_v52, 4  ;;  %v1769_v55 = vsel %vm1010_vm5, %v4761_v13, %v1241_v52  ;;  %v1344_v19 = vmul.f32 %v4075_v41, %v1342_v54 }
0x1abc   :  { %1347 = vrot.lane.b32.xlu1 %v1346_v53, %s4387_s2  ;;  %v1450_v56 = vrot.slane %v1344_v19, 6  ;;  %v4798_v57 = vsel %vm164_vm0, %v1769_v55, %v1344_v19 }
0x1abe   :  { %1451 = vrot.lane.b32.xlu0 %v1450_v56, %s4387_s2 }
0x1b2e   :  { %v1348_v59 = vpop.permute.xlu1 %1347 }
0x1b2f   :  { %3611 = vmatmul.mubr.msk.f32.vlgmr.msra.gmra.mrb[10].mxu1 %vm264_vm3, %v1348_v59 }
0x1b30   :  { %3876 = vmatpush3.bf16.msra.mxu1 %v4745_v8  ;;  %3632 = vmatprep.mubr.msk.f32.mxu1 %vm4385_vm2, %v4386_v21  ;;  %v1452_v22 = vpop.permute.xlu0 %1451 }
0x1b31   :  { %3877 = vmatprep.subr.bf16.mxu1 %v4384_v18  ;;  %3622 = vmatmul.mubr.msk.f32.vlgmr.msra.gmra.mrb[12].mxu0 %vm264_vm3, %v1452_v22 }
0x1b32   :  { %3882 = vmatpush3.bf16.msra.mxu0 %v4745_v8  ;;  %3643 = vmatprep.mubr.msk.f32.mxu0 %vm4385_vm2, %v4386_v21 }
0x1b33   :  { %3883 = vmatprep.subr.bf16.mxu0 %v4384_v18 }
0x1b34   :  { %3879 = vmatpush3.bf16.msra.mxu1 %v4752_v10 }
0x1b36   :  { %3885 = vmatpush3.bf16.msra.mxu0 %v4752_v10 }
0x1b37   :  { %3894 = vmatprep.subr.bf16.mxu0 %v4384_v18 }
0x1c02   :  { %v1417_v60 = vpop.f32.mrb[10].mxu1 }
0x1c03   :  { %v1421_v61 = vadd.f32 %v1417_v60, %v4733_v58  ;;  %v3612_v62 = vpop.f32.mrb[11].mxu1 }
0x1c04   :  { %v1521_v63 = vpop.f32.mrb[12].mxu0 }
0x1c05   :  { %4080 = vtanh.f32 %v1421_v61  ;;  %v1526_v0 = vrot.slane %v1521_v63, 6  ;;  %v3623_v1 = vpop.f32.mrb[13].mxu0  ;;  %v3298_v6 = vmul.f32 -1.442695, %v1421_v61 }
0x1c07   :  { %v1528_v2 = vadd.f32 %v1526_v0, %v4733_v58 }
0x1c09   :  { %4082 = vtanh.f32 %v1528_v2  ;;  %v3300_v8 = vmul.f32 -1.442695, %v1528_v2 }
0x1c0a   :  { %4084 = vpow2.f32 %v3298_v6  ;;  %v1779_v6 = vld [vmem:[%s5075_s7 + $0x8] sm:$0xff] }
0x1c0b   :  { %4086 = vpow2.f32 %v3300_v8  ;;  %v1780_v8 = vld [vmem:[%s5075_s7 + $0x10] sm:$0xff] }
0x1c0f   :  { %v4081_v3 = vpop.eup %4080 }
0x1c10   :  { %1434 = vrot.lane.b32.xlu1 %v4081_v3, %s4383_s25 }
0x1c13   :  { %v4083_v4 = vpop.eup %4082 }
0x1c14   :  { %1541 = vrot.lane.b32.xlu0 %v4083_v4, %s4383_s25  ;;  %v4085_v9 = vpop.eup %4084  ;;  %v1778_v4 = vld [vmem:[%s5075_s7] sm:$0xff] }
0x1c15   :  { %v1425_v10 = vadd.f32 1.0, %v4085_v9  ;;  %v4087_v11 = vpop.eup %4086  ;;  %v3886_v9 = vpack.c.bf16 %v1779_v6, %v1778_v4 }
0x1c16   :  { %v1532_v12 = vadd.f32 1.0, %v4087_v11 }
0x1c17   :  { %4088 = vrcp.f32 %v1425_v10  ;;  %v1781_v10 = vld [vmem:[%s5075_s7 + $0x18] sm:$0xff]  ;;  %3887 = vmatprep.subr.bf16.mxu1 %v3886_v9 }
0x1c18   :  { %4090 = vrcp.f32 %v1532_v12  ;;  %v3890_v12 = vpack.c.bf16 %v1781_v10, %v1780_v8 }
0x1c21   :  { %v4089_v13 = vpop.eup %4088 }
0x1c22   :  { %v4091_v16 = vpop.eup %4090  ;;  %v1432_v24 = vmul.f32 %v4089_v13, %v1430_v23 }
0x1c23   :  { %v1539_v27 = vmul.f32 %v4091_v16, %v1537_v7 }
0x1c82   :  { %v1435_v14 = vpop.permute.xlu1 %1434 }
0x1c83   :  { %v1437_v15 = vmul.f32 %v4089_v13, %v1435_v14 }
0x1c85   :  { %1439 = vrot.lane.b32.xlu1 %v1437_v15, %s4383_s25 }
0x1c86   :  { %v1542_v17 = vpop.permute.xlu0 %1541 }
0x1c87   :  { %v1544_v20 = vmul.f32 %v4091_v16, %v1542_v17 }
0x1c89   :  { %1546 = vrot.lane.b32.xlu0 %v1544_v20, %s4383_s25 }
0x1cf7   :  { %v1440_v25 = vpop.permute.xlu1 %1439 }
0x1cf8   :  { %v1442_v26 = vadd.f32 %v1440_v25, %v1432_v24 }
0x1cfa   :  { %4092 = vtanh.f32 %v1442_v26  ;;  %v1643_v60 = vrot.slane %v1442_v26, 4  ;;  %v3305_v26 = vld [vmem:[#allocation4] ss:$0 sm:$0xff] }
0x1cfb   :  { %v1547_v28 = vpop.permute.xlu0 %1546 }
0x1cfc   :  { %v1549_v29 = vadd.f32 %v1547_v28, %v1539_v27 }
0x1cfe   :  { %4094 = vtanh.f32 %v1549_v29  ;;  %v1750_v0 = vrot.slane %v1549_v29, 4 }
0x1d04   :  { %v4093_v31 = vpop.eup %4092 }
0x1d05   :  { %1445 = vrot.lane.b32.xlu1 %v4093_v31, %s4383_s25 }
0x1d08   :  { %v4095_v32 = vpop.eup %4094 }
0x1d09   :  { %1552 = vrot.lane.b32.xlu0 %v4095_v32, %s4383_s25 }
0x1d77   :  { %v1446_v33 = vpop.permute.xlu1 %1445 }
0x1d78   :  { %v1448_v34 = vmul.f32 %v4089_v13, %v1446_v33 }
0x1d7a   :  { %1557 = vrot.lane.b32.xlu0 %v1448_v34, %s4387_s2 }
0x1d7b   :  { %v1553_v35 = vpop.permute.xlu0 %1552 }
0x1d7c   :  { %v1555_v36 = vmul.f32 %v4091_v16, %v1553_v35 }
0x1d7e   :  { %v1663_v37 = vrot.slane %v1555_v36, 2  ;;  %v4826_v38 = vsel %vm1008_vm4, %v1448_v34, %v1555_v36 }
0x1d80   :  { %1664 = vrot.lane.b32.xlu1 %v1663_v37, %s4387_s2 }
0x1dec   :  { %v1558_v39 = vpop.permute.xlu0 %1557 }
0x1ded   :  { %3633 = vmatmul.mubr.msk.f32.vlgmr.msra.gmra.mrb[12].mxu1 %vm264_vm3, %v1558_v39  ;;  %v1775_v39 = vld [vmem:[%s5076_s8 + $0x8] sm:$0xff] }
0x1dee   :  { %3889 = vmatpush3.bf16.msra.mxu1 %v3886_v9 }
0x1def   :  { %3891 = vmatprep.subr.bf16.mxu1 %v3890_v12 }
0x1df2   :  { %v1665_v40 = vpop.permute.xlu1 %1664  ;;  %3893 = vmatpush3.bf16.msra.mxu1 %v3890_v12 }
0x1df3   :  { %3644 = vmatmul.mubr.msk.f32.vlgmr.msra.gmra.mrb[14].mxu0 %vm264_vm3, %v1665_v40  ;;  %3900 = vmatprep.subr.bf16.mxu1 %v4384_v18  ;;  %v1776_v40 = vld [vmem:[%s5076_s8 + $0x10] sm:$0xff] }
0x1df4   :  { %3665 = vmatprep.mubr.msk.f32.mxu0 %vm4385_vm2, %v4386_v21 }
0x1ec0   :  { %v1627_v41 = vpop.f32.mrb[12].mxu1 }
0x1ec1   :  { %v1632_v42 = vrot.slane %v1627_v41, 4  ;;  %v3634_v43 = vpop.f32.mrb[13].mxu1 }
0x1ec3   :  { %v1634_v44 = vadd.f32 %v1632_v42, %v4733_v58  ;;  %v1777_v42 = vld [vmem:[%s5076_s8 + $0x18] sm:$0xff] }
0x1ec4   :  { %v4886_v43 = vpack.c.bf16 %v1777_v42, %v1776_v40 }
0x1ec5   :  { %4096 = vtanh.f32 %v1634_v44  ;;  %v3302_v30 = vmul.f32 -1.442695, %v1634_v44 }
0x1ec6   :  { %v1734_v5 = vpop.f32.mrb[14].mxu0 }
0x1ec7   :  { %v1739_v45 = vrot.slane %v1734_v5, 2  ;;  %v3645_v46 = vpop.f32.mrb[15].mxu0 }
0x1ec9   :  { %v1741_v47 = vadd.f32 %v1739_v45, %v4733_v58 }
0x1ecb   :  { %4098 = vtanh.f32 %v1741_v47  ;;  %v3304_v50 = vmul.f32 -1.442695, %v1741_v47 }
0x1ecc   :  { %4100 = vpow2.f32 %v3302_v30 }
0x1ecd   :  { %4102 = vpow2.f32 %v3304_v50 }
0x1ecf   :  { %v4097_v48 = vpop.eup %4096 }
0x1ed0   :  { %1647 = vrot.lane.b32.xlu0 %v4097_v48, %s4383_s25 }
0x1ed5   :  { %v4099_v49 = vpop.eup %4098 }
0x1ed6   :  { %1754 = vrot.lane.b32.xlu1 %v4099_v49, %s4383_s25  ;;  %v4101_v51 = vpop.eup %4100 }
0x1ed7   :  { %v1638_v52 = vadd.f32 1.0, %v4101_v51  ;;  %v4103_v53 = vpop.eup %4102 }
0x1ed8   :  { %v1745_v54 = vadd.f32 1.0, %v4103_v53 }
0x1ed9   :  { %4104 = vrcp.f32 %v1638_v52 }
0x1eda   :  { %4106 = vrcp.f32 %v1745_v54 }
0x1ee3   :  { %v4105_v55 = vpop.eup %4104 }
0x1ee4   :  { %v4107_v56 = vpop.eup %4106  ;;  %v1645_v61 = vmul.f32 %v4105_v55, %v1643_v60 }
0x1ee5   :  { %v1752_v1 = vmul.f32 %v4107_v56, %v1750_v0 }
0x1f42   :  { %v1648_v19 = vpop.permute.xlu0 %1647 }
0x1f43   :  { %v1650_v58 = vmul.f32 %v4105_v55, %v1648_v19 }
0x1f45   :  { %1652 = vrot.lane.b32.xlu0 %v1650_v58, %s4383_s25 }
0x1f48   :  { %v1755_v59 = vpop.permute.xlu1 %1754 }
0x1f49   :  { %v1757_v22 = vmul.f32 %v4107_v56, %v1755_v59 }
0x1f4b   :  { %1759 = vrot.lane.b32.xlu1 %v1757_v22, %s4383_s25 }
0x1fb7   :  { %v1653_v62 = vpop.permute.xlu0 %1652 }
0x1fb8   :  { %v1655_v63 = vadd.f32 %v1653_v62, %v1645_v61 }
0x1fba   :  { %4108 = vtanh.f32 %v1655_v63 }
0x1fbd   :  { %v1760_v2 = vpop.permute.xlu1 %1759 }
0x1fbe   :  { %v1762_v3 = vadd.f32 %v1760_v2, %v1752_v1 }
0x1fc0   :  { %4110 = vtanh.f32 %v1762_v3 }
0x1fc4   :  { %v4109_v11 = vpop.eup %4108 }
0x1fc5   :  { %1658 = vrot.lane.b32.xlu0 %v4109_v11, %s4383_s25 }
0x1fc9   :  { %1791 = vrot.lane.b32.xlu0 %v4798_v57, %s4387_s2 }
0x1fca   :  { %v4111_v13 = vpop.eup %4110 }
0x1fcb   :  { %1765 = vrot.lane.b32.xlu1 %v4111_v13, %s4383_s25 }
0x2037   :  { %v1659_v14 = vpop.permute.xlu0 %1658 }
0x2038   :  { %v1661_v16 = vmul.f32 %v4105_v55, %v1659_v14 }
0x203a   :  { %v1772_v23 = vsel %vm1010_vm5, %v4826_v38, %v1661_v16  ;;  %v1774_v38 = vld [vmem:[%s5076_s8] sm:$0xff] }
0x203b   :  { %v1792_v15 = vpop.permute.xlu0 %1791  ;;  %v4879_v41 = vpack.c.bf16 %v1775_v39, %v1774_v38 }
0x203c   :  { %3654 = vmatprep.mubr.msk.f32.mxu1 %vm264_vm3, %v1792_v15 }
0x203d   :  { %v1766_v17 = vpop.permute.xlu1 %1765  ;;  %3896 = vmatpush3.bf16.msra.mxu0 %v4879_v41 }
0x203e   :  { %v1768_v20 = vmul.f32 %v4107_v56, %v1766_v17  ;;  %3897 = vmatprep.subr.bf16.mxu0 %v4384_v18 }
0x2040   :  { %v4860_v24 = vsel %vm164_vm0, %v1772_v23, %v1768_v20 }
0x2041   :  { %1793 = vrot.lane.b32.xlu1 %v4860_v24, %s4387_s2  ;;  %3899 = vmatpush3.bf16.msra.mxu0 %v4886_v43 }
0x2042   :  { %3906 = vmatprep.subr.bf16.mxu0 %v4384_v18 }
0x20b3   :  { %v1794_v25 = vpop.permute.xlu1 %1793 }
0x20b4   :  { %3655 = vmatmul.mubr.msk.f32.vlgmr.msra.gmra.mrb[14].mxu1 %vm264_vm3, %v1794_v25 }
0x20b5   :  { %3676 = vmatprep.mubr.msk.f32.mxu1 %vm4385_vm2, %v4386_v21  ;;  %3902 = vmatpush3.bf16.msra.mxu1 %v4879_v41 }
0x20b6   :  { %3903 = vmatprep.subr.bf16.mxu1 %v4384_v18 }
0x20b9   :  { %3905 = vmatpush3.bf16.msra.mxu1 %v4886_v43 }
0x20ba   :  { %3912 = vmatprep.subr.bf16.mxu1 %v4384_v18 }
0x2187   :  { %v3656_v7 = vpop.f32.mrb[14].mxu1 }
0x2188   :  { %v4867_v27 = vadd.f32 %v3656_v7, %v3305_v26  ;;  %v1865_v28 = vpop.f32.mrb[15].mxu1 }
0x2189   :  { %v1866_v29 = vadd.f32 %v3305_v26, %v1865_v28 }
0x218b   :  { %4112 = vtanh.f32 %v1866_v29  ;;  %v3308_v32 = vmul.f32 -1.442695, %v1866_v29 }
0x218d   :  { %4114 = vpow2.f32 %v3308_v32 }
0x2195   :  { %v4113_v31 = vpop.eup %4112 }
0x2196   :  { %1882 = vrot.lane.b32.xlu0 %v4113_v31, %s4383_s25 }
0x2197   :  { %v4115_v33 = vpop.eup %4114 }
0x2198   :  { %v1877_v34 = vadd.f32 1.0, %v4115_v33 }
0x219a   :  { %4116 = vrcp.f32 %v1877_v34 }
0x21a4   :  { %v4117_v35 = vpop.eup %4116 }
0x2208   :  { %v1883_v36 = vpop.permute.xlu0 %1882 }
0x2209   :  { %v1885_v37 = vmul.f32 %v4117_v35, %v1883_v36 }
0x220b   :  { %4118 = vtanh.f32 %v1885_v37  ;;  %v1979_v56 = vrot.slane %v1885_v37, 4 }
0x2215   :  { %v4119_v44 = vpop.eup %4118 }
0x2216   :  { %1888 = vrot.lane.b32.xlu1 %v4119_v44, %s4387_s2 }
0x2288   :  { %v1889_v5 = vpop.permute.xlu1 %1888 }
0x2289   :  { %v4895_v45 = vmul.f32 %v4117_v35, %v1889_v5 }
0x228b   :  { %1893 = vrot.lane.b32.xlu1 %v4895_v45, %s4387_s2  ;;  %v2000_v46 = vrot.slane %v4895_v45, 2 }
0x228d   :  { %2001 = vrot.lane.b32.xlu0 %v2000_v46, %s4387_s2 }
0x22fd   :  { %v1894_v47 = vpop.permute.xlu1 %1893 }
0x22fe   :  { %3666 = vmatmul.mubr.msk.f32.vlgmr.msra.gmra.mrb[16].mxu0 %vm264_vm3, %v1894_v47 }
0x22ff   :  { %v2002_v48 = vpop.permute.xlu0 %2001  ;;  %3908 = vmatpush3.bf16.msra.mxu0 %v4879_v41  ;;  %3687 = vmatprep.mubr.msk.f32.mxu0 %vm4385_vm2, %v4386_v21 }
0x2300   :  { %3677 = vmatmul.mubr.msk.f32.vlgmr.msra.gmra.mrb[16].mxu1 %vm264_vm3, %v2002_v48  ;;  %3909 = vmatprep.subr.bf16.mxu0 %v4384_v18 }
0x2301   :  { %3914 = vmatpush3.bf16.msra.mxu1 %v4879_v41  ;;  %3698 = vmatprep.mubr.msk.f32.mxu1 %vm4385_vm2, %v4386_v21 }
0x2302   :  { %3915 = vmatprep.subr.bf16.mxu1 %v4384_v18 }
0x2303   :  { %3911 = vmatpush3.bf16.msra.mxu0 %v4886_v43 }
0x2304   :  { %3918 = vmatprep.subr.bf16.mxu0 %v4384_v18 }
0x2305   :  { %3917 = vmatpush3.bf16.msra.mxu1 %v4886_v43 }
0x2306   :  { %3924 = vmatprep.subr.bf16.mxu1 %v4384_v18 }
0x23d1   :  { %v1963_v49 = vpop.f32.mrb[16].mxu0 }
0x23d2   :  { %v1968_v30 = vrot.slane %v1963_v49, 4  ;;  %v3667_v50 = vpop.f32.mrb[17].mxu0 }
0x23d3   :  { %v2071_v51 = vpop.f32.mrb[16].mxu1 }
0x23d4   :  { %v1970_v52 = vadd.f32 %v1968_v30, %v1866_v29  ;;  %v2076_v53 = vrot.slane %v2071_v51, 2  ;;  %v3678_v54 = vpop.f32.mrb[17].mxu1 }
0x23d6   :  { %4120 = vtanh.f32 %v1970_v52  ;;  %v2078_v55 = vadd.f32 %v2076_v53, %v1866_v29  ;;  %v3310_v59 = vmul.f32 -1.442695, %v1970_v52 }
0x23d8   :  { %4122 = vtanh.f32 %v2078_v55  ;;  %v3312_v22 = vmul.f32 -1.442695, %v2078_v55 }
0x23d9   :  { %4124 = vpow2.f32 %v3310_v59 }
0x23da   :  { %4126 = vpow2.f32 %v3312_v22 }
0x23e0   :  { %v4121_v19 = vpop.eup %4120 }
0x23e1   :  { %1985 = vrot.lane.b32.xlu1 %v4121_v19, %s4383_s25 }
0x23e2   :  { %v4123_v58 = vpop.eup %4122 }
0x23e3   :  { %2088 = vrot.lane.b32.xlu0 %v4123_v58, %s4383_s25  ;;  %v4125_v60 = vpop.eup %4124 }
0x23e4   :  { %v4127_v61 = vpop.eup %4126  ;;  %v1974_v62 = vadd.f32 1.0, %v4125_v60 }
0x23e5   :  { %v2082_v63 = vadd.f32 1.0, %v4127_v61 }
0x23e6   :  { %4128 = vrcp.f32 %v1974_v62 }
0x23e7   :  { %1980 = vrot.lane.b32.xlu0 %v1979_v56, %s4383_s25  ;;  %4130 = vrcp.f32 %v2082_v63 }
0x23f0   :  { %v4129_v0 = vpop.eup %4128 }
0x23f1   :  { %v4131_v3 = vpop.eup %4130 }
0x2453   :  { %v1986_v1 = vpop.permute.xlu1 %1985 }
0x2454   :  { %v1988_v2 = vmul.f32 %v4129_v0, %v1986_v1 }
0x2455   :  { %v2089_v4 = vpop.permute.xlu0 %2088 }
0x2456   :  { %1990 = vrot.lane.b32.xlu0 %v1988_v2, %s4383_s25  ;;  %v2091_v6 = vmul.f32 %v4131_v3, %v2089_v4 }
0x2458   :  { %2093 = vrot.lane.b32.xlu1 %v2091_v6, %s4383_s25 }
0x2459   :  { %v1981_v8 = vpop.permute.xlu0 %1980 }
0x245a   :  { %v1983_v9 = vmul.f32 %v4129_v0, %v1981_v8  ;;  %v2086_v12 = vmul.f32 %v4131_v3, %v1981_v8 }
0x24c8   :  { %v1991_v10 = vpop.permute.xlu0 %1990 }
0x24c9   :  { %v4920_v11 = vadd.f32 %v1991_v10, %v1983_v9 }
0x24ca   :  { %v2094_v13 = vpop.permute.xlu1 %2093 }
0x24cb   :  { %4132 = vtanh.f32 %v4920_v11  ;;  %v4923_v14 = vadd.f32 %v2094_v13, %v2086_v12  ;;  %v2188_v52 = vrot.slane %v4920_v11, 4 }
0x24cd   :  { %4134 = vtanh.f32 %v4923_v14  ;;  %v2295_v19 = vrot.slane %v4923_v14, 4 }
0x24d5   :  { %v4133_v15 = vpop.eup %4132 }
0x24d6   :  { %1996 = vrot.lane.b32.xlu0 %v4133_v15, %s4383_s25 }
0x24d7   :  { %v4135_v16 = vpop.eup %4134 }
0x24d8   :  { %2099 = vrot.lane.b32.xlu1 %v4135_v16, %s4383_s25 }
0x2548   :  { %v1997_v17 = vpop.permute.xlu0 %1996 }
0x2549   :  { %v1999_v20 = vmul.f32 %v4129_v0, %v1997_v17 }
0x254a   :  { %v2100_v25 = vpop.permute.xlu1 %2099 }
0x254b   :  { %v2104_v23 = vrot.slane %v1999_v20, 4  ;;  %v2527_v26 = vsel %vm1010_vm5, %v4895_v45, %v1999_v20  ;;  %v2102_v7 = vmul.f32 %v4131_v3, %v2100_v25 }
0x254d   :  { %2105 = vrot.lane.b32.xlu0 %v2104_v23, %s4387_s2  ;;  %v2208_v28 = vrot.slane %v2102_v7, 6  ;;  %v4932_v29 = vsel %vm164_vm0, %v2527_v26, %v2102_v7 }
0x254f   :  { %2209 = vrot.lane.b32.xlu1 %v2208_v28, %s4387_s2 }
0x25bf   :  { %v2106_v31 = vpop.permute.xlu0 %2105 }
0x25c0   :  { %3688 = vmatmul.mubr.msk.f32.vlgmr.msra.gmra.mrb[18].mxu0 %vm264_vm3, %v2106_v31 }
0x25c1   :  { %3920 = vmatpush3.bf16.msra.mxu0 %v4879_v41  ;;  %3709 = vmatprep.mubr.msk.f32.mxu0 %vm4385_vm2, %v4386_v21  ;;  %v2210_v32 = vpop.permute.xlu1 %2209 }
0x25c2   :  { %3921 = vmatprep.subr.bf16.mxu0 %v4384_v18  ;;  %3699 = vmatmul.mubr.msk.f32.vlgmr.msra.gmra.mrb[18].mxu1 %vm264_vm3, %v2210_v32 }
0x25c3   :  { %3926 = vmatpush3.bf16.msra.mxu1 %v4879_v41  ;;  %3720 = vmatprep.mubr.msk.f32.mxu1 %vm4385_vm2, %v4386_v21 }
0x25c4   :  { %3927 = vmatprep.subr.bf16.mxu1 %v4384_v18 }
0x25c5   :  { %3923 = vmatpush3.bf16.msra.mxu0 %v4886_v43 }
0x25c7   :  { %3929 = vmatpush3.bf16.msra.mxu1 %v4886_v43 }
0x25c8   :  { %3938 = vmatprep.subr.bf16.mxu1 %v4384_v18 }
0x2693   :  { %v2175_v33 = vpop.f32.mrb[18].mxu0 }
0x2694   :  { %v2179_v34 = vadd.f32 %v2175_v33, %v4867_v27  ;;  %v3689_v35 = vpop.f32.mrb[19].mxu0 }
0x2695   :  { %v2279_v36 = vpop.f32.mrb[18].mxu1 }
0x2696   :  { %4136 = vtanh.f32 %v2179_v34  ;;  %v2284_v37 = vrot.slane %v2279_v36, 6  ;;  %v3700_v38 = vpop.f32.mrb[19].mxu1  ;;  %v3314_v42 = vmul.f32 -1.442695, %v2179_v34 }
0x2698   :  { %v2286_v39 = vadd.f32 %v2284_v37, %v4867_v27 }
0x269a   :  { %4138 = vtanh.f32 %v2286_v39  ;;  %v3316_v43 = vmul.f32 -1.442695, %v2286_v39 }
0x269b   :  { %4140 = vpow2.f32 %v3314_v42 }
0x269c   :  { %4142 = vpow2.f32 %v3316_v43  ;;  %v2536_v43 = vld [vmem:[#allocation6] sm:$0xff] }
0x26a0   :  { %v4137_v40 = vpop.eup %4136 }
0x26a1   :  { %2192 = vrot.lane.b32.xlu0 %v4137_v40, %s4383_s25 }
0x26a4   :  { %v4139_v41 = vpop.eup %4138 }
0x26a5   :  { %2299 = vrot.lane.b32.xlu1 %v4139_v41, %s4383_s25  ;;  %v4141_v44 = vpop.eup %4140 }
0x26a6   :  { %v2183_v5 = vadd.f32 1.0, %v4141_v44  ;;  %v4143_v45 = vpop.eup %4142  ;;  %v2537_v44 = vld [vmem:[#allocation6 + $0x8] sm:$0xff] }
0x26a7   :  { %v2290_v46 = vadd.f32 1.0, %v4143_v45  ;;  %v3930_v45 = vpack.c.bf16 %v2537_v44, %v2536_v43 }
0x26a8   :  { %4144 = vrcp.f32 %v2183_v5  ;;  %v2538_v5 = vld [vmem:[#allocation6 + $0x10] sm:$0xff] }
0x26a9   :  { %4146 = vrcp.f32 %v2290_v46  ;;  %v2539_v46 = vld [vmem:[#allocation6 + $0x18] sm:$0xff]  ;;  %3931 = vmatprep.subr.bf16.mxu0 %v3930_v45 }
0x26b2   :  { %v4145_v47 = vpop.eup %4144 }
0x26b3   :  { %v4147_v30 = vpop.eup %4146  ;;  %v2190_v53 = vmul.f32 %v4145_v47, %v2188_v52 }
0x26b4   :  { %v2297_v58 = vmul.f32 %v4147_v30, %v2295_v19  ;;  %v3321_v19 = vld [vmem:[#allocation9] ss:$0 sm:$0xff] }
0x2713   :  { %v2193_v48 = vpop.permute.xlu0 %2192 }
0x2714   :  { %v2195_v49 = vmul.f32 %v4145_v47, %v2193_v48  ;;  %v3934_v48 = vpack.c.bf16 %v2539_v46, %v2538_v5 }
0x2716   :  { %2197 = vrot.lane.b32.xlu0 %v2195_v49, %s4383_s25 }
0x2717   :  { %v2300_v50 = vpop.permute.xlu1 %2299 }
0x2718   :  { %v2302_v51 = vmul.f32 %v4147_v30, %v2300_v50 }
0x271a   :  { %2304 = vrot.lane.b32.xlu1 %v2302_v51, %s4383_s25 }
0x2788   :  { %v2198_v54 = vpop.permute.xlu0 %2197 }
0x2789   :  { %v2200_v55 = vadd.f32 %v2198_v54, %v2190_v53 }
0x278b   :  { %4148 = vtanh.f32 %v2200_v55  ;;  %v2401_v35 = vrot.slane %v2200_v55, 4 }
0x278c   :  { %v2305_v56 = vpop.permute.xlu1 %2304 }
0x278d   :  { %v2307_v59 = vadd.f32 %v2305_v56, %v2297_v58 }
0x278f   :  { %4150 = vtanh.f32 %v2307_v59  ;;  %v2508_v39 = vrot.slane %v2307_v59, 4 }
0x2795   :  { %v4149_v22 = vpop.eup %4148 }
0x2796   :  { %2203 = vrot.lane.b32.xlu0 %v4149_v22, %s4383_s25 }
0x2799   :  { %v4151_v60 = vpop.eup %4150 }
0x279a   :  { %2310 = vrot.lane.b32.xlu1 %v4151_v60, %s4383_s25 }
0x2808   :  { %v2204_v61 = vpop.permute.xlu0 %2203 }
0x2809   :  { %v2206_v62 = vmul.f32 %v4145_v47, %v2204_v61 }
0x280b   :  { %2315 = vrot.lane.b32.xlu1 %v2206_v62, %s4387_s2 }
0x280c   :  { %v2311_v63 = vpop.permute.xlu1 %2310 }
0x280d   :  { %v2313_v0 = vmul.f32 %v4147_v30, %v2311_v63 }
0x280f   :  { %v2421_v1 = vrot.slane %v2313_v0, 2  ;;  %v4960_v2 = vsel %vm1008_vm4, %v2206_v62, %v2313_v0 }
0x2811   :  { %2422 = vrot.lane.b32.xlu0 %v2421_v1, %s4387_s2 }
0x287d   :  { %v2316_v3 = vpop.permute.xlu1 %2315 }
0x287e   :  { %3710 = vmatmul.mubr.msk.f32.vlgmr.msra.gmra.mrb[20].mxu0 %vm264_vm3, %v2316_v3  ;;  %v2532_v3 = vld [vmem:[#allocation7] sm:$0xff] }
0x287f   :  { %3933 = vmatpush3.bf16.msra.mxu0 %v3930_v45 }
0x2880   :  { %3935 = vmatprep.subr.bf16.mxu0 %v3934_v48 }
0x2883   :  { %v2423_v4 = vpop.permute.xlu0 %2422  ;;  %3937 = vmatpush3.bf16.msra.mxu0 %v3934_v48 }
0x2884   :  { %3721 = vmatmul.mubr.msk.f32.vlgmr.msra.gmra.mrb[20].mxu1 %vm264_vm3, %v2423_v4  ;;  %3944 = vmatprep.subr.bf16.mxu0 %v4384_v18  ;;  %v2533_v4 = vld [vmem:[#allocation7 + $0x8] sm:$0xff] }
0x2885   :  { %3742 = vmatprep.mubr.msk.f32.mxu1 %vm4385_vm2, %v4386_v21 }
0x2951   :  { %v2385_v6 = vpop.f32.mrb[20].mxu0 }
0x2952   :  { %v2390_v8 = vrot.slane %v2385_v6, 4  ;;  %v3711_v9 = vpop.f32.mrb[21].mxu0  ;;  %v2534_v6 = vld [vmem:[#allocation7 + $0x10] sm:$0xff] }
0x2953   :  { %v2535_v9 = vld [vmem:[#allocation7 + $0x18] sm:$0xff] }
0x2954   :  { %v2392_v10 = vadd.f32 %v2390_v8, %v4867_v27  ;;  %v3939_v8 = vpack.c.bf16 %v2533_v4, %v2532_v3 }
0x2956   :  { %4152 = vtanh.f32 %v2392_v10  ;;  %v3318_v17 = vmul.f32 -1.442695, %v2392_v10  ;;  %3940 = vmatpush3.bf16.msra.mxu1 %v3939_v8  ;;  %v3942_v10 = vpack.c.bf16 %v2535_v9, %v2534_v6 }
0x2957   :  { %v2492_v11 = vpop.f32.mrb[20].mxu1  ;;  %3941 = vmatprep.subr.bf16.mxu1 %v4384_v18 }
0x2958   :  { %v2497_v12 = vrot.slane %v2492_v11, 2  ;;  %v3722_v13 = vpop.f32.mrb[21].mxu1 }
0x295a   :  { %v2499_v14 = vadd.f32 %v2497_v12, %v4867_v27  ;;  %3943 = vmatpush3.bf16.msra.mxu1 %v3942_v10 }
0x295b   :  { %3950 = vmatprep.subr.bf16.mxu1 %v4384_v18 }
0x295c   :  { %4154 = vtanh.f32 %v2499_v14  ;;  %v3320_v20 = vmul.f32 -1.442695, %v2499_v14 }
0x295d   :  { %4156 = vpow2.f32 %v3318_v17 }
0x295e   :  { %4158 = vpow2.f32 %v3320_v20 }
0x2960   :  { %v4153_v15 = vpop.eup %4152 }
0x2961   :  { %2405 = vrot.lane.b32.xlu1 %v4153_v15, %s4383_s25 }
0x2966   :  { %v4155_v16 = vpop.eup %4154 }
0x2967   :  { %2512 = vrot.lane.b32.xlu0 %v4155_v16, %s4383_s25  ;;  %v4157_v23 = vpop.eup %4156 }
0x2968   :  { %v2396_v25 = vadd.f32 1.0, %v4157_v23  ;;  %v4159_v26 = vpop.eup %4158 }
0x2969   :  { %v2503_v7 = vadd.f32 1.0, %v4159_v26 }
0x296a   :  { %4160 = vrcp.f32 %v2396_v25 }
0x296b   :  { %4162 = vrcp.f32 %v2503_v7 }
0x2974   :  { %v4161_v28 = vpop.eup %4160 }
0x2975   :  { %v4163_v32 = vpop.eup %4162  ;;  %v2403_v36 = vmul.f32 %v4161_v28, %v2401_v35 }
0x2976   :  { %v2510_v40 = vmul.f32 %v4163_v32, %v2508_v39 }
0x29d3   :  { %v2406_v31 = vpop.permute.xlu1 %2405 }
0x29d4   :  { %v2408_v27 = vmul.f32 %v4161_v28, %v2406_v31 }
0x29d6   :  { %2410 = vrot.lane.b32.xlu1 %v2408_v27, %s4383_s25 }
0x29d9   :  { %v2513_v33 = vpop.permute.xlu0 %2512 }
0x29da   :  { %v2515_v34 = vmul.f32 %v4163_v32, %v2513_v33 }
0x29dc   :  { %2517 = vrot.lane.b32.xlu0 %v2515_v34, %s4383_s25 }
0x2a48   :  { %v2411_v37 = vpop.permute.xlu1 %2410 }
0x2a49   :  { %v2413_v38 = vadd.f32 %v2411_v37, %v2403_v36 }
0x2a4b   :  { %4164 = vtanh.f32 %v2413_v38 }
0x2a4e   :  { %v2518_v41 = vpop.permute.xlu0 %2517 }
0x2a4f   :  { %v2520_v42 = vadd.f32 %v2518_v41, %v2510_v40 }
0x2a51   :  { %4166 = vtanh.f32 %v2520_v42 }
0x2a55   :  { %v4165_v47 = vpop.eup %4164 }
0x2a56   :  { %2416 = vrot.lane.b32.xlu1 %v4165_v47, %s4383_s25 }
0x2a5a   :  { %2549 = vrot.lane.b32.xlu1 %v4932_v29, %s4387_s2 }
0x2a5b   :  { %v4167_v49 = vpop.eup %4166 }
0x2a5c   :  { %2523 = vrot.lane.b32.xlu0 %v4167_v49, %s4383_s25 }
0x2ac8   :  { %v2417_v30 = vpop.permute.xlu1 %2416 }
0x2ac9   :  { %v2419_v51 = vmul.f32 %v4161_v28, %v2417_v30 }
0x2acb   :  { %v2530_v54 = vsel %vm1010_vm5, %v4960_v2, %v2419_v51 }
0x2acc   :  { %v2550_v50 = vpop.permute.xlu1 %2549 }
0x2acd   :  { %3731 = vmatprep.mubr.msk.f32.mxu0 %vm264_vm3, %v2550_v50 }
0x2ace   :  { %v2524_v52 = vpop.permute.xlu0 %2523 }
0x2acf   :  { %v2526_v53 = vmul.f32 %v4163_v32, %v2524_v52 }
0x2ad1   :  { %v2531_v55 = vsel %vm164_vm0, %v2530_v54, %v2526_v53 }
0x2ad2   :  { %2551 = vrot.lane.b32.xlu0 %v2531_v55, %s4387_s2 }
0x2b44   :  { %v2552_v29 = vpop.permute.xlu0 %2551 }
0x2b45   :  { %3732 = vmatmul.mubr.msk.f32.vlgmr.msra.gmra.mrb[22].mxu0 %vm264_vm3, %v2552_v29 }
0x2b46   :  { %3753 = vmatprep.mubr.msk.f32.mxu0 %vm4385_vm2, %v4386_v21  ;;  %3946 = vmatpush3.bf16.msra.mxu0 %v3939_v8 }
0x2b47   :  { %3947 = vmatprep.subr.bf16.mxu0 %v4384_v18 }
0x2b4a   :  { %3949 = vmatpush3.bf16.msra.mxu0 %v3942_v10 }
0x2b4b   :  { %3956 = vmatprep.subr.bf16.mxu0 %v4384_v18 }
0x2c18   :  { %v3733_v58 = vpop.f32.mrb[22].mxu0 }
0x2c19   :  { %v4986_v56 = vadd.f32 %v3733_v58, %v3321_v19  ;;  %v2623_v59 = vpop.f32.mrb[23].mxu0 }
0x2c1a   :  { %v2624_v22 = vadd.f32 %v3321_v19, %v2623_v59 }
0x2c1c   :  { %4168 = vtanh.f32 %v2624_v22  ;;  %v3324_v61 = vmul.f32 -1.442695, %v2624_v22 }
0x2c1e   :  { %4170 = vpow2.f32 %v3324_v61 }
0x2c26   :  { %v4169_v60 = vpop.eup %4168 }
0x2c27   :  { %2640 = vrot.lane.b32.xlu1 %v4169_v60, %s4383_s25 }
0x2c28   :  { %v4171_v62 = vpop.eup %4170 }
0x2c29   :  { %v2635_v63 = vadd.f32 1.0, %v4171_v62 }
0x2c2b   :  { %4172 = vrcp.f32 %v2635_v63 }
0x2c35   :  { %v4173_v0 = vpop.eup %4172 }
0x2c99   :  { %v2641_v1 = vpop.permute.xlu1 %2640 }
0x2c9a   :  { %v4989_v2 = vmul.f32 %v4173_v0, %v2641_v1 }
0x2c9c   :  { %4174 = vtanh.f32 %v4989_v2 }
0x2ca6   :  { %v4175_v11 = vpop.eup %4174 }
0x2ca7   :  { %2646 = vrot.lane.b32.xlu0 %v4175_v11, %s4387_s2 }
0x2d19   :  { %v2647_v12 = vpop.permute.xlu0 %2646 }
0x2d1a   :  { %v4997_v13 = vmul.f32 %v4173_v0, %v2647_v12 }
0x2d1c   :  { %2651 = vrot.lane.b32.xlu1 %v4997_v13, %s4387_s2  ;;  %v2754_v14 = vrot.slane %v4997_v13, 2  ;;  %v2857_v15 = vrot.slane %v4997_v13, 4  ;;  %v2960_v16 = vrot.slane %v4997_v13, 6 }
0x2d1e   :  { %2755 = vrot.lane.b32.xlu0 %v2754_v14, %s4387_s2 }
0x2d20   :  { %2858 = vrot.lane.b32.xlu1 %v2857_v15, %s4387_s2 }
0x2d22   :  { %2961 = vrot.lane.b32.xlu0 %v2960_v16, %s4387_s2 }
0x2d8e   :  { %v2652_v17 = vpop.permute.xlu1 %2651 }
0x2d8f   :  { %3743 = vmatmul.mubr.msk.f32.vlgmr.msra.gmra.mrb[22].mxu1 %vm264_vm3, %v2652_v17 }
0x2d90   :  { %3952 = vmatpush3.bf16.msra.mxu1 %v3939_v8  ;;  %v2756_v20 = vpop.permute.xlu0 %2755  ;;  %3764 = vmatprep.mubr.msk.f32.mxu1 %vm4385_vm2, %v4386_v21 }
0x2d91   :  { %3754 = vmatmul.mubr.msk.f32.vlgmr.msra.gmra.mrb[24].mxu0 %vm264_vm3, %v2756_v20  ;;  %3953 = vmatprep.subr.bf16.mxu1 %v4384_v18  ;;  %v3070_v20 = vld [vmem:[#allocation10] sm:$0xff] }
0x2d92   :  { %3958 = vmatpush3.bf16.msra.mxu0 %v3939_v8  ;;  %3775 = vmatprep.mubr.msk.f32.mxu0 %vm4385_vm2, %v4386_v21  ;;  %v2859_v23 = vpop.permute.xlu1 %2858 }
0x2d93   :  { %3959 = vmatprep.subr.bf16.mxu0 %v4384_v18 }
0x2d94   :  { %3955 = vmatpush3.bf16.msra.mxu1 %v3942_v10  ;;  %v2962_v25 = vpop.permute.xlu0 %2961 }
0x2d96   :  { %3961 = vmatpush3.bf16.msra.mxu0 %v3942_v10 }
0x2d97   :  { %3765 = vmatmul.mubr.msk.f32.vlgmr.msra.gmra.mrb[24].mxu1 %vm264_vm3, %v2859_v23  ;;  %v3071_v23 = vld [vmem:[#allocation10 + $0x8] sm:$0xff] }
0x2d99   :  { %3776 = vmatmul.mubr.msk.f32.vlgmr.msra.gmra.mrb[26].mxu0 %vm264_vm3, %v2962_v25  ;;  %v3072_v25 = vld [vmem:[#allocation10 + $0x10] sm:$0xff] }
0x2e62   :  { %v2721_v26 = vpop.f32.mrb[22].mxu1 }
0x2e63   :  { %v2725_v7 = vadd.f32 %v2721_v26, %v4986_v56  ;;  %v3744_v28 = vpop.f32.mrb[23].mxu1  ;;  %v3962_v26 = vpack.c.bf16 %v3071_v23, %v3070_v20 }
0x2e64   :  { %v2825_v31 = vpop.f32.mrb[24].mxu0 }
0x2e65   :  { %4176 = vtanh.f32 %v2725_v7  ;;  %v2830_v27 = vrot.slane %v2825_v31, 6  ;;  %v3755_v32 = vpop.f32.mrb[25].mxu0  ;;  %v3326_v44 = vmul.f32 -1.442695, %v2725_v7  ;;  %v3073_v7 = vld [vmem:[#allocation10 + $0x18] sm:$0xff]  ;;  %3963 = vmatprep.subr.bf16.mxu1 %v3962_v26 }
0x2e66   :  { %v3966_v28 = vpack.c.bf16 %v3073_v7, %v3072_v25  ;;  %3965 = vmatpush3.bf16.msra.mxu1 %v3962_v26  ;;  %v3068_v32 = vadd.f32 %v4997_v13, %v4798_v57 }
0x2e67   :  { %v2832_v21 = vadd.f32 %v2830_v27, %v4986_v56 }
0x2e68   :  { %3967 = vmatprep.subr.bf16.mxu1 %v3966_v28 }
0x2e69   :  { %4178 = vtanh.f32 %v2832_v21  ;;  %v3328_v5 = vmul.f32 -1.442695, %v2832_v21 }
0x2e6a   :  { %v2928_v18 = vpop.f32.mrb[24].mxu1  ;;  %3969 = vmatpush3.bf16.msra.mxu1 %v3966_v28 }
0x2e6b   :  { %v2933_v33 = vrot.slane %v2928_v18, 4  ;;  %v3766_v34 = vpop.f32.mrb[25].mxu1 }
0x2e6c   :  { %v3031_v35 = vpop.f32.mrb[26].mxu0 }
0x2e6d   :  { %v2935_v36 = vadd.f32 %v2933_v33, %v4986_v56  ;;  %v3036_v37 = vrot.slane %v3031_v35, 2  ;;  %v3777_v38 = vpop.f32.mrb[27].mxu0 }
0x2e6f   :  { %v4177_v39 = vpop.eup %4176  ;;  %4180 = vtanh.f32 %v2935_v36  ;;  %v3038_v40 = vadd.f32 %v3036_v37, %v4986_v56  ;;  %v3330_v45 = vmul.f32 -1.442695, %v2935_v36 }
0x2e70   :  { %2739 = vrot.lane.b32.xlu1 %v4177_v39, %s4383_s25 }
0x2e71   :  { %4182 = vtanh.f32 %v3038_v40  ;;  %v3332_v46 = vmul.f32 -1.442695, %v3038_v40 }
0x2e72   :  { %4184 = vpow2.f32 %v3326_v44  ;;  %v3169_v44 = vld [vmem:[%s5083_s15 + $0x8] sm:$0xff] }
0x2e73   :  { %v4179_v41 = vpop.eup %4178  ;;  %4186 = vpow2.f32 %v3328_v5  ;;  %v3170_v5 = vld [vmem:[%s5083_s15 + $0x10] sm:$0xff] }
0x2e74   :  { %2842 = vrot.lane.b32.xlu0 %v4179_v41, %s4383_s25  ;;  %4188 = vpow2.f32 %v3330_v45 }
0x2e75   :  { %4190 = vpow2.f32 %v3332_v46 }
0x2e79   :  { %v4181_v42 = vpop.eup %4180 }
0x2e7a   :  { %2945 = vrot.lane.b32.xlu1 %v4181_v42, %s4383_s25 }
0x2e7b   :  { %v4183_v43 = vpop.eup %4182 }
0x2e7c   :  { %3048 = vrot.lane.b32.xlu0 %v4183_v43, %s4383_s25  ;;  %v4185_v47 = vpop.eup %4184  ;;  %v3168_v43 = vld [vmem:[%s5083_s15] sm:$0xff] }
0x2e7d   :  { %v2729_v48 = vadd.f32 1.0, %v4185_v47  ;;  %v4187_v49 = vpop.eup %4186  ;;  %v3970_v45 = vpack.c.bf16 %v3169_v44, %v3168_v43  ;;  %v3333_v47 = vld [vmem:[#allocation12] ss:$0 sm:$0xff] }
0x2e7e   :  { %2734 = vrot.lane.b32.xlu1 %v4989_v2, %s4383_s25  ;;  %v2836_v30 = vadd.f32 1.0, %v4187_v49  ;;  %v4189_v50 = vpop.eup %4188 }
0x2e7f   :  { %4192 = vrcp.f32 %v2729_v48  ;;  %v4191_v51 = vpop.eup %4190  ;;  %v2939_v52 = vadd.f32 1.0, %v4189_v50  ;;  %3971 = vmatprep.subr.bf16.mxu0 %v3970_v45 }
0x2e80   :  { %4194 = vrcp.f32 %v2836_v30  ;;  %v3042_v53 = vadd.f32 1.0, %v4191_v51  ;;  %3973 = vmatpush3.bf16.msra.mxu0 %v3970_v45 }
0x2e81   :  { %4196 = vrcp.f32 %v2939_v52 }
0x2e82   :  { %4198 = vrcp.f32 %v3042_v53  ;;  %v3336_v53 = vld [vmem:[%s5084_s16] ss:$0 sm:$0xff] }
0x2e89   :  { %v4193_v54 = vpop.eup %4192 }
0x2e8a   :  { %v4195_v19 = vpop.eup %4194 }
0x2e8b   :  { %v4197_v59 = vpop.eup %4196 }
0x2e8c   :  { %v4199_v61 = vpop.eup %4198 }
0x2ee2   :  { %v2740_v55 = vpop.permute.xlu1 %2739 }
0x2ee3   :  { %v2742_v29 = vmul.f32 %v4193_v54, %v2740_v55 }
0x2ee5   :  { %2744 = vrot.lane.b32.xlu0 %v2742_v29, %s4383_s25 }
0x2ee6   :  { %v2843_v58 = vpop.permute.xlu0 %2842 }
0x2ee7   :  { %v2845_v56 = vmul.f32 %v4195_v19, %v2843_v58 }
0x2ee9   :  { %2847 = vrot.lane.b32.xlu1 %v2845_v56, %s4383_s25 }
0x2eec   :  { %v2946_v22 = vpop.permute.xlu1 %2945 }
0x2eed   :  { %v2948_v60 = vmul.f32 %v4197_v59, %v2946_v22 }
0x2eee   :  { %v3049_v62 = vpop.permute.xlu0 %3048 }
0x2eef   :  { %2950 = vrot.lane.b32.xlu0 %v2948_v60, %s4383_s25  ;;  %v3051_v63 = vmul.f32 %v4199_v61, %v3049_v62 }
0x2ef0   :  { %v2735_v0 = vpop.permute.xlu1 %2734 }
0x2ef1   :  { %3053 = vrot.lane.b32.xlu1 %v3051_v63, %s4383_s25  ;;  %v2737_v1 = vmul.f32 %v4193_v54, %v2735_v0  ;;  %v2840_v4 = vmul.f32 %v4195_v19, %v2735_v0  ;;  %v2943_v9 = vmul.f32 %v4197_v59, %v2735_v0  ;;  %v3046_v12 = vmul.f32 %v4199_v61, %v2735_v0 }
0x2f57   :  { %v2745_v2 = vpop.permute.xlu0 %2744 }
0x2f58   :  { %v2747_v3 = vadd.f32 %v2745_v2, %v2737_v1 }
0x2f5a   :  { %4200 = vtanh.f32 %v2747_v3 }
0x2f5b   :  { %v2848_v6 = vpop.permute.xlu1 %2847 }
0x2f5c   :  { %v2850_v8 = vadd.f32 %v2848_v6, %v2840_v4 }
0x2f5e   :  { %4202 = vtanh.f32 %v2850_v8 }
0x2f61   :  { %v2951_v10 = vpop.permute.xlu0 %2950 }
0x2f62   :  { %v2953_v11 = vadd.f32 %v2951_v10, %v2943_v9 }
0x2f63   :  { %v3054_v15 = vpop.permute.xlu1 %3053 }
0x2f64   :  { %v4201_v14 = vpop.eup %4200  ;;  %4204 = vtanh.f32 %v2953_v11  ;;  %v3056_v16 = vadd.f32 %v3054_v15, %v3046_v12 }
0x2f65   :  { %2750 = vrot.lane.b32.xlu0 %v4201_v14, %s4383_s25 }
0x2f66   :  { %4206 = vtanh.f32 %v3056_v16 }
0x2f68   :  { %v4203_v17 = vpop.eup %4202 }
0x2f69   :  { %2853 = vrot.lane.b32.xlu1 %v4203_v17, %s4383_s25 }
0x2f6e   :  { %v4205_v31 = vpop.eup %4204 }
0x2f6f   :  { %2956 = vrot.lane.b32.xlu0 %v4205_v31, %s4383_s25 }
0x2f70   :  { %v4207_v27 = vpop.eup %4206 }
0x2f71   :  { %3059 = vrot.lane.b32.xlu1 %v4207_v27, %s4383_s25 }
0x2f73   :  { %3083 = vrot.lane.b32.xlu0 %v3068_v32, %s4387_s2 }
0x2fd7   :  { %v2751_v18 = vpop.permute.xlu0 %2750 }
0x2fd8   :  { %v2753_v34 = vmul.f32 %v4193_v54, %v2751_v18 }
0x2fdb   :  { %v2854_v21 = vpop.permute.xlu1 %2853 }
0x2fdc   :  { %v2856_v33 = vmul.f32 %v4195_v19, %v2854_v21 }
0x2fde   :  { %v3065_v37 = vsel %vm1008_vm4, %v2753_v34, %v2856_v33 }
0x2fe1   :  { %v2957_v35 = vpop.permute.xlu0 %2956 }
0x2fe2   :  { %v2959_v36 = vmul.f32 %v4197_v59, %v2957_v35 }
0x2fe3   :  { %v3060_v39 = vpop.permute.xlu1 %3059 }
0x2fe4   :  { %v3066_v38 = vsel %vm1010_vm5, %v3065_v37, %v2959_v36  ;;  %v3062_v40 = vmul.f32 %v4199_v61, %v3060_v39 }
0x2fe5   :  { %v3084_v41 = vpop.permute.xlu0 %3083 }
0x2fe6   :  { %3786 = vmatprep.mubr.msk.f32.mxu1 %vm264_vm3, %v3084_v41  ;;  %v3067_v57 = vsel %vm164_vm0, %v3066_v38, %v3062_v40 }
0x2fe7   :  { %v3069_v13 = vadd.f32 %v3067_v57, %v4860_v24  ;;  %v3171_v24 = vld [vmem:[%s5083_s15 + $0x18] sm:$0xff] }
0x2fe8   :  { %v3974_v46 = vpack.c.bf16 %v3171_v24, %v3170_v5 }
0x2fe9   :  { %3085 = vrot.lane.b32.xlu1 %v3069_v13, %s4387_s2 }
0x2fea   :  { %3975 = vmatprep.subr.bf16.mxu0 %v3974_v46 }
0x2feb   :  { %3977 = vmatpush3.bf16.msra.mxu0 %v3974_v46 }
0x305b   :  { %v3086_v42 = vpop.permute.xlu1 %3085 }
0x305c   :  { %3787 = vmatmul.mubr.msk.f32.vlgmr.msra.gmra.mrb[26].mxu1 %vm264_vm3, %v3086_v42 }
0x312f   :  { %v3788_v48 = vpop.f32.mrb[26].mxu1 }
0x3130   :  { %v3163_v49 = vadd.f32 %v3788_v48, %v3333_v47  ;;  %v3157_v30 = vpop.f32.mrb[27].mxu1 }
0x3131   :  { %v3158_v50 = vadd.f32 %v3333_v47, %v3157_v30 }
0x3133   :  { %4208 = vtanh.f32 %v3158_v50 }
0x3134   :  { %4210 = vtanh.f32 %v3163_v49 }
0x313d   :  { %v4209_v51 = vpop.eup %4208 }
0x313e   :  { %v4211_v52 = vpop.eup %4210  ;;  %3797 = vmatprep.mubr.msk.f32.mxu0 %vm264_vm3, %v4209_v51 }
0x313f   :  { %3798 = vmatmul.mubr.msk.f32.vlgmr.msra.gmra.mrb[28].mxu0 %vm264_vm3, %v4211_v52 }
0x3212   :  { %v3799_v54 = vpop.f32.mrb[28].mxu0 }
0x3213   :  { %v3257_v55 = vadd.f32 %v3799_v54, %v3336_v53  ;;  %v3251_v29 = vpop.f32.mrb[29].mxu0 }
0x3214   :  { %v3252_v19 = vadd.f32 %v3336_v53, %v3251_v29 }
0x3215   :  { %3261 = vst [vmem:[%s5085_s17 + $0x8] sm:$0xff] %v3257_v55 }
0x3216   :  { %3260 = vst [vmem:[%s5085_s17] sm:$0xff] %v3252_v19 }
0x3217   :  { %3266 = vsyncpa [#allocation3], 1 }
0x3218   :  { %3267 = vsyncpa [#allocation5], 1 }
0x3219   :  { %3268 = vsyncpa [#allocation8], 1 }
0x321a   :  { %3269 = vsyncpa [#allocation11], 1 }

</bundles_post_ra>
